<compile_context>
chip_gen: v7x
topology: tpu7x:2x2x1
jax: 0.10.0
libtpu: 0.0.40
codegen_flags: <defaults>
</compile_context>

<pallas_src>
import math
import numpy as np
import jax
import jax.numpy as jnp
from jax import lax
from jax.experimental import pallas as pl
from jax.experimental.pallas import tpu as pltpu

NEG_MIN_F32 = float(np.finfo(np.float32).min)   # used by the pure-JAX reference
MASK_BIAS = -1.0e38                             # additive mask bias: exp underflows to 0, no -inf/NaN


def _round_up(x, m):
    return ((x + m - 1) // m) * m


def _take_masks(t1):
    """Per-bit row-selection masks for the barrel shifter (computed once per call)."""
    row = lax.broadcasted_iota(jnp.int32, (t1, 1), 0)
    amount = (t1 - 1) - row                      # per-row circular left-roll amount
    nbits = max(1, (t1 - 1).bit_length())
    return [((amount >> b) & 1) == 1 for b in range(nbits)]


def _rel_shift(bd, take, t2):
    """Relative-position shift: out[i, j] = bd[i, (t1 - 1 - i) + j], j in [0, t2).

    bd has shape (t1, W) with W a multiple of 128 and W >= 2*t1 - 1 (extra
    columns are zero padding and never read).  Barrel shifter: one uniform
    circular left-roll (pltpu.roll, XLU slot) + per-row select per bit of the
    roll amount, MSB -> LSB, truncating the lane width as the remaining shift
    shrinks (widths kept at multiples of 128 so rolls stay vreg-aligned).
    """
    x = bd
    for b in reversed(range(len(take))):
        s = 1 << b
        # Remaining shift (this bit + lower bits) <= 2^(b+1)-1, so lanes beyond
        # t2 + 2^(b+1) - 2 are never needed again.
        w_new = min(x.shape[1], _round_up(t2 + (1 << (b + 1)) - 1, 128))
        if w_new < x.shape[1]:
            x = x[:, :w_new]
        w = x.shape[1]
        rolled = pltpu.roll(x, shift=w - s, axis=1)     # circular LEFT roll by s
        x = jnp.where(take[b], rolled, x)
    return x[:, :t2]


def _make_kernel(n_head):
    def kernel(q_ref, k_ref, v_ref, p_ref, bias_ref, keep_ref,
               wq_ref, bq_ref, wk_ref, bk_ref, wv_ref, bv_ref,
               pbu_ref, pbv_ref, wout_ref, bout_ref,
               out_ref, ctx_ref):
        T1 = q_ref.shape[1]
        T2 = k_ref.shape[1]
        F = q_ref.shape[2]
        d_k = F // n_head
        bf16 = jnp.bfloat16

        x_q = q_ref[0]          # (T1, F) bf16
        x_k = k_ref[0]          # (T2, F) bf16
        x_v = v_ref[0]          # (T2, F) bf16
        p_b = p_ref[...]        # (P_pad, F) bf16 — projected + padded in the wrapper

        # Full-width projections: bf16 MXU matmuls, f32 accumulate.
        # The 1/sqrt(d_k) scale is pre-folded into wq / bq / pbu / pbv (wrapper).
        q = jnp.dot(x_q, wq_ref[...], preferred_element_type=jnp.float32) + bq_ref[...]
        k = jnp.dot(x_k, wk_ref[...], preferred_element_type=jnp.float32) + bk_ref[...]
        v = jnp.dot(x_v, wv_ref[...], preferred_element_type=jnp.float32) + bv_ref[...]

        q_u = (q + pbu_ref[...]).astype(bf16)    # (T1, F)
        q_v = (q + pbv_ref[...]).astype(bf16)    # (T1, F)
        k_b = k.astype(bf16)
        # Zero masked value rows once:  attn @ (v*keep) == (attn masked to 0) @ v,
        # and fully-masked rows come out exactly 0 (PyTorch masked_fill(0.0)).
        v_b = (v * keep_ref[0]).astype(bf16)     # (T2, F)

        bias = bias_ref[0]                       # (1, T2): -1e38 on masked cols, 0 else
        take = _take_masks(T1)                   # hoisted out of the head loop

        contract = (((1,), (1,)), ((), ()))      # contract on d_k, no transpose needed
        for h in range(n_head):                  # static unroll over heads
            lo = h * d_k
            hi = lo + d_k
            ac = lax.dot_general(q_u[:, lo:hi], k_b[:, lo:hi], contract,
                                 preferred_element_type=jnp.float32)    # (T1, T2)
            bd = lax.dot_general(q_v[:, lo:hi], p_b[:, lo:hi], contract,
                                 preferred_element_type=jnp.float32)    # (T1, P_pad)
            scores = ac + _rel_shift(bd, take, T2) + bias               # scale pre-folded

            m = jnp.max(scores, axis=-1, keepdims=True)
            e = jnp.exp(scores - m)
            denom = jnp.sum(e, axis=-1, keepdims=True)
            attn = e * pl.reciprocal(denom, approx=True)
            # dropout is identity (inference / dropout_rate = 0.0)

            ctx_ref[:, lo:hi] = jnp.dot(attn.astype(bf16), v_b[:, lo:hi],
                                        preferred_element_type=jnp.float32)

        out = jnp.dot(ctx_ref[...].astype(bf16), wout_ref[...],
                      preferred_element_type=jnp.float32) + bout_ref[...]
        out_ref[0] = out                         # single lane-dense store

    return kernel


def _vmem_limit_bytes():
    try:
        cap = int(pltpu.get_tpu_info().vmem_capacity_bytes)
    except Exception:
        cap = 64 * 1024 * 1024                   # conservative (safe on v7x too)
    # Leave ~1/8 headroom for compiler-internal scratch; cap at 112 MiB.
    return min(cap - cap // 8, 112 * 1024 * 1024)


def rel_position_mha(query, key, value, pos_emb, mask, params, n_head):
    B, T1, F = query.shape
    T2 = key.shape[1]
    P = pos_emb.shape[1]
    d_k = F // n_head
    assert F % n_head == 0
    assert T1 == T2, "rel-position attention requires time1 == time2"
    assert P == 2 * T1 - 1
    assert pos_emb.shape[0] == 1
    # TODO(synk): mask of shape (B, time1, time2) not supported (broadcast (B,1,T2) only).
    assert mask.shape == (B, 1, T2)

    scale = 1.0 / math.sqrt(d_k)
    bf16 = jnp.bfloat16
    f32 = jnp.float32

    # ----- glue: fold 1/sqrt(d_k) into q-path params, cast weights to bf16 -----
    wq = (params['wq'] * scale).astype(bf16)
    wk = params['wk'].astype(bf16)
    wv = params['wv'].astype(bf16)
    wout = params['wout'].astype(bf16)
    bq = (params['bq'] * scale).reshape(1, F).astype(f32)
    bk = params['bk'].reshape(1, F).astype(f32)
    bv = params['bv'].reshape(1, F).astype(f32)
    bout = params['bout'].reshape(1, F).astype(f32)
    pbu = (params['pos_bias_u'] * scale).reshape(1, F).astype(f32)
    pbv = (params['pos_bias_v'] * scale).reshape(1, F).astype(f32)

    # Positional projection hoisted out of the kernel (batch-invariant), padded
    # with zero rows to a multiple of 128 so bd and its rolls are lane-dense.
    P_pad = _round_up(P, 128)
    p_proj = jnp.dot(pos_emb[0].astype(f32), params['wpos'].astype(f32))     # (P, F)
    if P_pad != P:
        p_proj = jnp.pad(p_proj, ((0, P_pad - P), (0, 0)))
    p_proj = p_proj.astype(bf16)

    # Mask preprocessing hoisted to the wrapper (O(B*T2) XLA work).
    mask_i = mask.astype(jnp.int32)
    bias_row = jnp.where(mask_i == 0, jnp.float32(MASK_BIAS), jnp.float32(0.0))  # (B,1,T2)
    keep_col = (mask_i != 0).astype(f32).reshape(B, T2, 1)                        # (B,T2,1)

    q_in = query.astype(bf16)
    k_in = key.astype(bf16)
    v_in = value.astype(bf16)

    bspec = pl.BlockSpec
    # TODO(synk): mark the grid-invariant operands below with
    #   pipeline_mode=pl.Buffered(1) (single-buffer) for extra VMEM headroom on v7x.
    in_specs = [
        bspec((1, T1, F), lambda b: (b, 0, 0)),   # query
        bspec((1, T2, F), lambda b: (b, 0, 0)),   # key
        bspec((1, T2, F), lambda b: (b, 0, 0)),   # value
        bspec((P_pad, F), lambda b: (0, 0)),      # pos projection (precomputed, padded)
        bspec((1, 1, T2), lambda b: (b, 0, 0)),   # additive mask bias
        bspec((1, T2, 1), lambda b: (b, 0, 0)),   # value keep mask
        bspec((F, F), lambda b: (0, 0)),          # wq  (scale folded, bf16)
        bspec((1, F), lambda b: (0, 0)),          # bq  (scale folded)
        bspec((F, F), lambda b: (0, 0)),          # wk
        bspec((1, F), lambda b: (0, 0)),          # bk
        bspec((F, F), lambda b: (0, 0)),          # wv
        bspec((1, F), lambda b: (0, 0)),          # bv
        bspec((1, F), lambda b: (0, 0)),          # pos_bias_u (flat, scaled)
        bspec((1, F), lambda b: (0, 0)),          # pos_bias_v (flat, scaled)
        bspec((F, F), lambda b: (0, 0)),          # wout
        bspec((1, F), lambda b: (0, 0)),          # bout
    ]
    out_spec = bspec((1, T1, F), lambda b: (b, 0, 0))

    return pl.pallas_call(
        _make_kernel(n_head),
        out_shape=jax.ShapeDtypeStruct((B, T1, F), f32),
        grid_spec=pltpu.PrefetchScalarGridSpec(
            num_scalar_prefetch=0,
            grid=(B,),
            in_specs=in_specs,
            out_specs=out_spec,
            scratch_shapes=[pltpu.VMEM((T1, F), f32)],   # per-head context accumulator
        ),
        compiler_params=pltpu.CompilerParams(
            dimension_semantics=("parallel",),
            vmem_limit_bytes=_vmem_limit_bytes()),
    )(q_in, k_in, v_in, p_proj, bias_row, keep_col,
      wq, bq, wk, bk, wv, bv, pbu, pbv, wout, bout)


# ----- pure-JAX reference mirroring the PyTorch module (for correctness check) -----
def ref_forward(query, key, value, pos_emb, mask, params, n_head):
    B, T1, F = query.shape
    d_k = F // n_head
    q = (query @ params['wq'] + params['bq']).reshape(B, T1, n_head, d_k).transpose(0, 2, 1, 3)
    k = (key @ params['wk'] + params['bk']).reshape(B, -1, n_head, d_k).transpose(0, 2, 1, 3)
    v = (value @ params['wv'] + params['bv']).reshape(B, -1, n_head, d_k).transpose(0, 2, 1, 3)
    p = (pos_emb @ params['wpos']).reshape(pos_emb.shape[0], -1, n_head, d_k).transpose(0, 2, 1, 3)
    q_u = q + params['pos_bias_u'][None, :, None, :]
    q_v = q + params['pos_bias_v'][None, :, None, :]
    ac = jnp.einsum('bhid,bhjd->bhij', q_u, k)
    bd = jnp.einsum('bhid,hpd->bhip', q_v, p[0])
    b_, h_, t1, L = bd.shape
    zero_pad = jnp.zeros((b_, h_, t1, 1), bd.dtype)
    x_padded = jnp.concatenate([zero_pad, bd], axis=-1).reshape(b_, h_, L + 1, t1)
    bd_shift = x_padded[:, :, 1:].reshape(b_, h_, t1, L)[:, :, :, : L // 2 + 1]
    scores = (ac + bd_shift) / math.sqrt(d_k)
    masked = (mask[:, None] == 0)
    scores = jnp.where(masked, NEG_MIN_F32, scores)
    attn = jax.nn.softmax(scores, axis=-1)
    attn = jnp.where(masked, 0.0, attn)
    x = jnp.einsum('bhij,bhjd->bhid', attn, v)
    x = x.transpose(0, 2, 1, 3).reshape(B, T1, F)
    return x @ params['wout'] + params['bout']


if __name__ == "__main__":
    B, T, F, H = 2, 8, 32, 4          # n_head=4, n_feat=32, time1=time2=8
    dk = F // H
    P = 2 * T - 1

    root = jax.random.PRNGKey(0)
    keys = jax.random.split(root, 16)

    def lin_w(k, fan_in, shape):
        bound = 1.0 / math.sqrt(fan_in)
        return jax.random.uniform(k, shape, jnp.float32, -bound, bound)

    xav = math.sqrt(6.0 / (H + dk))
    params = {
        'wq': lin_w(keys[0], F, (F, F)), 'bq': lin_w(keys[1], F, (F,)),
        'wk': lin_w(keys[2], F, (F, F)), 'bk': lin_w(keys[3], F, (F,)),
        'wv': lin_w(keys[4], F, (F, F)), 'bv': lin_w(keys[5], F, (F,)),
        'wpos': lin_w(keys[6], F, (F, F)),
        'wout': lin_w(keys[7], F, (F, F)), 'bout': lin_w(keys[8], F, (F,)),
        'pos_bias_u': jax.random.uniform(keys[9], (H, dk), jnp.float32, -xav, xav),
        'pos_bias_v': jax.random.uniform(keys[10], (H, dk), jnp.float32, -xav, xav),
    }

    query = jax.random.normal(keys[11], (B, T, F), jnp.float32)
    key_t = jax.random.normal(keys[12], (B, T, F), jnp.float32)
    value = jax.random.normal(keys[13], (B, T, F), jnp.float32)
    pos_emb = jax.random.normal(keys[14], (1, P, F), jnp.float32)
    lengths = jnp.array([T, T - 2])
    mask = (jnp.arange(T)[None, None, :] < lengths[:, None, None]).astype(jnp.int32)  # (B,1,T)

    out = rel_position_mha(query, key_t, value, pos_emb, mask, params, H)
    out = jax.block_until_ready(out)

    # f32 "ground truth" reference; kernel uses bf16 MXU inputs -> loose tolerance.
    with jax.default_matmul_precision("highest"):
        ref = ref_forward(query, key_t, value, pos_emb, mask, params, H)
    ref = jax.block_until_ready(ref)

    np.testing.assert_allclose(np.asarray(out), np.asarray(ref), rtol=2e-2, atol=2e-2)
    print("KERNEL_OK")
</pallas_src>

<mosaic_0001>
module attributes {stable_mosaic.version = 11 : i64} {
  func.func @kernel(%arg0: i32, %arg1: memref<1x8x32xbf16, #tpu.memory_space<vmem>>, %arg2: memref<1x8x32xbf16, #tpu.memory_space<vmem>>, %arg3: memref<1x8x32xbf16, #tpu.memory_space<vmem>>, %arg4: memref<128x32xbf16, #tpu.memory_space<vmem>>, %arg5: memref<1x1x8xf32, #tpu.memory_space<vmem>>, %arg6: memref<1x8x1xf32, #tpu.memory_space<vmem>>, %arg7: memref<32x32xbf16, #tpu.memory_space<vmem>>, %arg8: memref<1x32xf32, #tpu.memory_space<vmem>>, %arg9: memref<32x32xbf16, #tpu.memory_space<vmem>>, %arg10: memref<1x32xf32, #tpu.memory_space<vmem>>, %arg11: memref<32x32xbf16, #tpu.memory_space<vmem>>, %arg12: memref<1x32xf32, #tpu.memory_space<vmem>>, %arg13: memref<1x32xf32, #tpu.memory_space<vmem>>, %arg14: memref<1x32xf32, #tpu.memory_space<vmem>>, %arg15: memref<32x32xbf16, #tpu.memory_space<vmem>>, %arg16: memref<1x32xf32, #tpu.memory_space<vmem>>, %arg17: memref<1x8x32xf32, #tpu.memory_space<vmem>>, %arg18: memref<8x32xf32, #tpu.memory_space<vmem>>) attributes {dimension_semantics = [#tpu.dimension_semantics<parallel>], iteration_bounds = array<i64: 2>, scalar_prefetch = 0 : i64, scratch_operands = 1 : i64, tpu.core_type = #tpu.core_type<tc>, window_params = [{transform_indices = @transform_0, window_bounds = array<i64: 1, 8, 32>}, {transform_indices = @transform_1, window_bounds = array<i64: 1, 8, 32>}, {transform_indices = @transform_2, window_bounds = array<i64: 1, 8, 32>}, {pipeline_mode = #tpu.pipeline_mode<synchronous>, transform_indices = @transform_3, window_bounds = array<i64: 128, 32>}, {transform_indices = @transform_4, window_bounds = array<i64: 1, 1, 8>}, {transform_indices = @transform_5, window_bounds = array<i64: 1, 8, 1>}, {pipeline_mode = #tpu.pipeline_mode<synchronous>, transform_indices = @transform_6, window_bounds = array<i64: 32, 32>}, {pipeline_mode = #tpu.pipeline_mode<synchronous>, transform_indices = @transform_7, window_bounds = array<i64: 1, 32>}, {pipeline_mode = #tpu.pipeline_mode<synchronous>, transform_indices = @transform_8, window_bounds = array<i64: 32, 32>}, {pipeline_mode = #tpu.pipeline_mode<synchronous>, transform_indices = @transform_9, window_bounds = array<i64: 1, 32>}, {pipeline_mode = #tpu.pipeline_mode<synchronous>, transform_indices = @transform_10, window_bounds = array<i64: 32, 32>}, {pipeline_mode = #tpu.pipeline_mode<synchronous>, transform_indices = @transform_11, window_bounds = array<i64: 1, 32>}, {pipeline_mode = #tpu.pipeline_mode<synchronous>, transform_indices = @transform_12, window_bounds = array<i64: 1, 32>}, {pipeline_mode = #tpu.pipeline_mode<synchronous>, transform_indices = @transform_13, window_bounds = array<i64: 1, 32>}, {pipeline_mode = #tpu.pipeline_mode<synchronous>, transform_indices = @transform_14, window_bounds = array<i64: 32, 32>}, {pipeline_mode = #tpu.pipeline_mode<synchronous>, transform_indices = @transform_15, window_bounds = array<i64: 1, 32>}, {transform_indices = @transform_16, window_bounds = array<i64: 1, 8, 32>}]} {
    %c0 = arith.constant 0 : index
    %c0_0 = arith.constant 0 : index
    %c0_1 = arith.constant 0 : index
    %0 = vector.load %arg1[%c0, %c0_0, %c0_1] : memref<1x8x32xbf16, #tpu.memory_space<vmem>>, vector<1x8x32xbf16>
    %1 = vector.shape_cast %0 : vector<1x8x32xbf16> to vector<8x32xbf16>
    %c0_2 = arith.constant 0 : index
    %c0_3 = arith.constant 0 : index
    %c0_4 = arith.constant 0 : index
    %2 = vector.load %arg2[%c0_2, %c0_3, %c0_4] : memref<1x8x32xbf16, #tpu.memory_space<vmem>>, vector<1x8x32xbf16>
    %3 = vector.shape_cast %2 : vector<1x8x32xbf16> to vector<8x32xbf16>
    %c0_5 = arith.constant 0 : index
    %c0_6 = arith.constant 0 : index
    %c0_7 = arith.constant 0 : index
    %4 = vector.load %arg3[%c0_5, %c0_6, %c0_7] : memref<1x8x32xbf16, #tpu.memory_space<vmem>>, vector<1x8x32xbf16>
    %5 = vector.shape_cast %4 : vector<1x8x32xbf16> to vector<8x32xbf16>
    %c0_8 = arith.constant 0 : index
    %c0_9 = arith.constant 0 : index
    %6 = vector.load %arg4[%c0_8, %c0_9] : memref<128x32xbf16, #tpu.memory_space<vmem>>, vector<128x32xbf16>
    %c0_10 = arith.constant 0 : index
    %c0_11 = arith.constant 0 : index
    %7 = vector.load %arg7[%c0_10, %c0_11] : memref<32x32xbf16, #tpu.memory_space<vmem>>, vector<32x32xbf16>
    %cst = arith.constant dense<0.000000e+00> : vector<8x32xf32>
    %8 = tpu.matmul %1, %7, %cst {dimension_numbers = #tpu.dot_dimension_numbers<[1], [0], [0], [1], [0, 0, 1, 1], [], []>} : vector<8x32xbf16>, vector<32x32xbf16>, vector<8x32xf32> -> vector<8x32xf32>
    %c0_12 = arith.constant 0 : index
    %c0_13 = arith.constant 0 : index
    %9 = vector.load %arg8[%c0_12, %c0_13] : memref<1x32xf32, #tpu.memory_space<vmem>>, vector<1x32xf32>
    %10 = vector.broadcast %9 : vector<1x32xf32> to vector<8x32xf32>
    %11 = arith.addf %8, %10 : vector<8x32xf32>
    %c0_14 = arith.constant 0 : index
    %c0_15 = arith.constant 0 : index
    %12 = vector.load %arg9[%c0_14, %c0_15] : memref<32x32xbf16, #tpu.memory_space<vmem>>, vector<32x32xbf16>
    %cst_16 = arith.constant dense<0.000000e+00> : vector<8x32xf32>
    %13 = tpu.matmul %3, %12, %cst_16 {dimension_numbers = #tpu.dot_dimension_numbers<[1], [0], [0], [1], [0, 0, 1, 1], [], []>} : vector<8x32xbf16>, vector<32x32xbf16>, vector<8x32xf32> -> vector<8x32xf32>
    %c0_17 = arith.constant 0 : index
    %c0_18 = arith.constant 0 : index
    %14 = vector.load %arg10[%c0_17, %c0_18] : memref<1x32xf32, #tpu.memory_space<vmem>>, vector<1x32xf32>
    %15 = vector.broadcast %14 : vector<1x32xf32> to vector<8x32xf32>
    %16 = arith.addf %13, %15 : vector<8x32xf32>
    %c0_19 = arith.constant 0 : index
    %c0_20 = arith.constant 0 : index
    %17 = vector.load %arg11[%c0_19, %c0_20] : memref<32x32xbf16, #tpu.memory_space<vmem>>, vector<32x32xbf16>
    %cst_21 = arith.constant dense<0.000000e+00> : vector<8x32xf32>
    %18 = tpu.matmul %5, %17, %cst_21 {dimension_numbers = #tpu.dot_dimension_numbers<[1], [0], [0], [1], [0, 0, 1, 1], [], []>} : vector<8x32xbf16>, vector<32x32xbf16>, vector<8x32xf32> -> vector<8x32xf32>
    %c0_22 = arith.constant 0 : index
    %c0_23 = arith.constant 0 : index
    %19 = vector.load %arg12[%c0_22, %c0_23] : memref<1x32xf32, #tpu.memory_space<vmem>>, vector<1x32xf32>
    %20 = vector.broadcast %19 : vector<1x32xf32> to vector<8x32xf32>
    %21 = arith.addf %18, %20 : vector<8x32xf32>
    %c0_24 = arith.constant 0 : index
    %c0_25 = arith.constant 0 : index
    %22 = vector.load %arg13[%c0_24, %c0_25] : memref<1x32xf32, #tpu.memory_space<vmem>>, vector<1x32xf32>
    %23 = vector.broadcast %22 : vector<1x32xf32> to vector<8x32xf32>
    %24 = arith.addf %11, %23 : vector<8x32xf32>
    %25 = arith.truncf %24 : vector<8x32xf32> to vector<8x32xbf16>
    %c0_26 = arith.constant 0 : index
    %c0_27 = arith.constant 0 : index
    %26 = vector.load %arg14[%c0_26, %c0_27] : memref<1x32xf32, #tpu.memory_space<vmem>>, vector<1x32xf32>
    %27 = vector.broadcast %26 : vector<1x32xf32> to vector<8x32xf32>
    %28 = arith.addf %11, %27 : vector<8x32xf32>
    %29 = arith.truncf %28 : vector<8x32xf32> to vector<8x32xbf16>
    %30 = arith.truncf %16 : vector<8x32xf32> to vector<8x32xbf16>
    %c0_28 = arith.constant 0 : index
    %c0_29 = arith.constant 0 : index
    %c0_30 = arith.constant 0 : index
    %31 = vector.load %arg6[%c0_28, %c0_29, %c0_30] : memref<1x8x1xf32, #tpu.memory_space<vmem>>, vector<1x8x1xf32>
    %32 = vector.shape_cast %31 : vector<1x8x1xf32> to vector<8x1xf32>
    %33 = vector.broadcast %32 : vector<8x1xf32> to vector<8x32xf32>
    %34 = arith.mulf %21, %33 : vector<8x32xf32>
    %35 = arith.truncf %34 : vector<8x32xf32> to vector<8x32xbf16>
    %c0_31 = arith.constant 0 : index
    %c0_32 = arith.constant 0 : index
    %c0_33 = arith.constant 0 : index
    %36 = vector.load %arg5[%c0_31, %c0_32, %c0_33] : memref<1x1x8xf32, #tpu.memory_space<vmem>>, vector<1x1x8xf32>
    %37 = vector.shape_cast %36 : vector<1x1x8xf32> to vector<1x8xf32>
    %38 = tpu.iota {dimensions = array<i32: 0>} : vector<8x1xi32>
    %c7_i32 = arith.constant 7 : i32
    %39 = vector.broadcast %c7_i32 : i32 to vector<8x1xi32>
    %40 = arith.subi %39, %38 : vector<8x1xi32>
    %c0_i32 = arith.constant 0 : i32
    %41 = vector.broadcast %c0_i32 : i32 to vector<8x1xi32>
    %42 = arith.shrsi %40, %41 : vector<8x1xi32>
    %c1_i32 = arith.constant 1 : i32
    %43 = vector.broadcast %c1_i32 : i32 to vector<8x1xi32>
    %44 = arith.andi %42, %43 : vector<8x1xi32>
    %c1_i32_34 = arith.constant 1 : i32
    %45 = vector.broadcast %c1_i32_34 : i32 to vector<8x1xi32>
    %46 = arith.cmpi eq, %44, %45 : vector<8x1xi32>
    %c1_i32_35 = arith.constant 1 : i32
    %47 = vector.broadcast %c1_i32_35 : i32 to vector<8x1xi32>
    %48 = arith.shrsi %40, %47 : vector<8x1xi32>
    %c1_i32_36 = arith.constant 1 : i32
    %49 = vector.broadcast %c1_i32_36 : i32 to vector<8x1xi32>
    %50 = arith.andi %48, %49 : vector<8x1xi32>
    %c1_i32_37 = arith.constant 1 : i32
    %51 = vector.broadcast %c1_i32_37 : i32 to vector<8x1xi32>
    %52 = arith.cmpi eq, %50, %51 : vector<8x1xi32>
    %c2_i32 = arith.constant 2 : i32
    %53 = vector.broadcast %c2_i32 : i32 to vector<8x1xi32>
    %54 = arith.shrsi %40, %53 : vector<8x1xi32>
    %c1_i32_38 = arith.constant 1 : i32
    %55 = vector.broadcast %c1_i32_38 : i32 to vector<8x1xi32>
    %56 = arith.andi %54, %55 : vector<8x1xi32>
    %c1_i32_39 = arith.constant 1 : i32
    %57 = vector.broadcast %c1_i32_39 : i32 to vector<8x1xi32>
    %58 = arith.cmpi eq, %56, %57 : vector<8x1xi32>
    %59 = vector.extract_strided_slice %25 {offsets = [0, 0], sizes = [8, 8], strides = [1, 1]} : vector<8x32xbf16> to vector<8x8xbf16>
    %60 = vector.extract_strided_slice %30 {offsets = [0, 0], sizes = [8, 8], strides = [1, 1]} : vector<8x32xbf16> to vector<8x8xbf16>
    %cst_40 = arith.constant dense<0.000000e+00> : vector<8x8xf32>
    %61 = tpu.matmul %59, %60, %cst_40 {dimension_numbers = #tpu.dot_dimension_numbers<[1], [1], [0], [0], [0, 0, 1, 0], [], []>} : vector<8x8xbf16>, vector<8x8xbf16>, vector<8x8xf32> -> vector<8x8xf32>
    %62 = vector.extract_strided_slice %29 {offsets = [0, 0], sizes = [8, 8], strides = [1, 1]} : vector<8x32xbf16> to vector<8x8xbf16>
    %63 = vector.extract_strided_slice %6 {offsets = [0, 0], sizes = [128, 8], strides = [1, 1]} : vector<128x32xbf16> to vector<128x8xbf16>
    %cst_41 = arith.constant dense<0.000000e+00> : vector<8x128xf32>
    %64 = tpu.matmul %62, %63, %cst_41 {dimension_numbers = #tpu.dot_dimension_numbers<[1], [1], [0], [0], [0, 0, 1, 0], [], []>} : vector<8x8xbf16>, vector<128x8xbf16>, vector<8x128xf32> -> vector<8x128xf32>
    %c124_i32 = arith.constant 124 : i32
    %65 = tpu.dynamic_rotate %64 by %c124_i32 dim 1 : vector<8x128xf32>, i32 -> vector<8x128xf32>
    %66 = vector.shape_cast %58 : vector<8x1xi1> to vector<8x1xi1>
    %67 = vector.broadcast %66 : vector<8x1xi1> to vector<8x128xi1>
    %68 = arith.select %67, %65, %64 : vector<8x128xi1>, vector<8x128xf32>
    %c126_i32 = arith.constant 126 : i32
    %69 = tpu.dynamic_rotate %68 by %c126_i32 dim 1 : vector<8x128xf32>, i32 -> vector<8x128xf32>
    %70 = vector.shape_cast %52 : vector<8x1xi1> to vector<8x1xi1>
    %71 = vector.broadcast %70 : vector<8x1xi1> to vector<8x128xi1>
    %72 = arith.select %71, %69, %68 : vector<8x128xi1>, vector<8x128xf32>
    %c127_i32 = arith.constant 127 : i32
    %73 = tpu.dynamic_rotate %72 by %c127_i32 dim 1 : vector<8x128xf32>, i32 -> vector<8x128xf32>
    %74 = vector.shape_cast %46 : vector<8x1xi1> to vector<8x1xi1>
    %75 = vector.broadcast %74 : vector<8x1xi1> to vector<8x128xi1>
    %76 = arith.select %75, %73, %72 : vector<8x128xi1>, vector<8x128xf32>
    %77 = vector.extract_strided_slice %76 {offsets = [0, 0], sizes = [8, 8], strides = [1, 1]} : vector<8x128xf32> to vector<8x8xf32>
    %78 = arith.addf %61, %77 : vector<8x8xf32>
    %79 = vector.broadcast %37 : vector<1x8xf32> to vector<8x8xf32>
    %80 = arith.addf %78, %79 : vector<8x8xf32>
    %cst_42 = arith.constant dense<0xFF800000> : vector<8xf32>
    %81 = vector.multi_reduction <maximumf>, %80, %cst_42 [1] : vector<8x8xf32> to vector<8xf32>
    %82 = vector.shape_cast %81 : vector<8xf32> to vector<8x1xf32>
    %83 = vector.broadcast %82 : vector<8x1xf32> to vector<8x8xf32>
    %84 = arith.subf %80, %83 : vector<8x8xf32>
    %85 = math.exp %84 : vector<8x8xf32>
    %cst_43 = arith.constant dense<0.000000e+00> : vector<8xf32>
    %86 = vector.multi_reduction <add>, %85, %cst_43 [1] : vector<8x8xf32> to vector<8xf32>
    %87 = vector.shape_cast %86 : vector<8xf32> to vector<8x1xf32>
    %88 = tpu.reciprocal %87 {approx = true} : vector<8x1xf32> -> vector<8x1xf32>
    %89 = vector.broadcast %88 : vector<8x1xf32> to vector<8x8xf32>
    %90 = arith.mulf %85, %89 : vector<8x8xf32>
    %91 = arith.truncf %90 : vector<8x8xf32> to vector<8x8xbf16>
    %92 = vector.extract_strided_slice %35 {offsets = [0, 0], sizes = [8, 8], strides = [1, 1]} : vector<8x32xbf16> to vector<8x8xbf16>
    %cst_44 = arith.constant dense<0.000000e+00> : vector<8x8xf32>
    %93 = tpu.matmul %91, %92, %cst_44 {dimension_numbers = #tpu.dot_dimension_numbers<[1], [0], [0], [1], [0, 0, 1, 1], [], []>} : vector<8x8xbf16>, vector<8x8xbf16>, vector<8x8xf32> -> vector<8x8xf32>
    %c0_45 = arith.constant 0 : index
    %c0_46 = arith.constant 0 : index
    %94 = vector.load %arg18[%c0_45, %c0_46] : memref<8x32xf32, #tpu.memory_space<vmem>>, vector<8x8xf32>
    tpu.vector_store %arg18[%c0_45, %c0_46], %93 {strides = array<i32>} : memref<8x32xf32, #tpu.memory_space<vmem>>, vector<8x8xf32>,
    %95 = vector.extract_strided_slice %25 {offsets = [0, 8], sizes = [8, 8], strides = [1, 1]} : vector<8x32xbf16> to vector<8x8xbf16>
    %96 = vector.extract_strided_slice %30 {offsets = [0, 8], sizes = [8, 8], strides = [1, 1]} : vector<8x32xbf16> to vector<8x8xbf16>
    %cst_47 = arith.constant dense<0.000000e+00> : vector<8x8xf32>
    %97 = tpu.matmul %95, %96, %cst_47 {dimension_numbers = #tpu.dot_dimension_numbers<[1], [1], [0], [0], [0, 0, 1, 0], [], []>} : vector<8x8xbf16>, vector<8x8xbf16>, vector<8x8xf32> -> vector<8x8xf32>
    %98 = vector.extract_strided_slice %29 {offsets = [0, 8], sizes = [8, 8], strides = [1, 1]} : vector<8x32xbf16> to vector<8x8xbf16>
    %99 = vector.extract_strided_slice %6 {offsets = [0, 8], sizes = [128, 8], strides = [1, 1]} : vector<128x32xbf16> to vector<128x8xbf16>
    %cst_48 = arith.constant dense<0.000000e+00> : vector<8x128xf32>
    %100 = tpu.matmul %98, %99, %cst_48 {dimension_numbers = #tpu.dot_dimension_numbers<[1], [1], [0], [0], [0, 0, 1, 0], [], []>} : vector<8x8xbf16>, vector<128x8xbf16>, vector<8x128xf32> -> vector<8x128xf32>
    %c124_i32_49 = arith.constant 124 : i32
    %101 = tpu.dynamic_rotate %100 by %c124_i32_49 dim 1 : vector<8x128xf32>, i32 -> vector<8x128xf32>
    %102 = vector.shape_cast %58 : vector<8x1xi1> to vector<8x1xi1>
    %103 = vector.broadcast %102 : vector<8x1xi1> to vector<8x128xi1>
    %104 = arith.select %103, %101, %100 : vector<8x128xi1>, vector<8x128xf32>
    %c126_i32_50 = arith.constant 126 : i32
    %105 = tpu.dynamic_rotate %104 by %c126_i32_50 dim 1 : vector<8x128xf32>, i32 -> vector<8x128xf32>
    %106 = vector.shape_cast %52 : vector<8x1xi1> to vector<8x1xi1>
    %107 = vector.broadcast %106 : vector<8x1xi1> to vector<8x128xi1>
    %108 = arith.select %107, %105, %104 : vector<8x128xi1>, vector<8x128xf32>
    %c127_i32_51 = arith.constant 127 : i32
    %109 = tpu.dynamic_rotate %108 by %c127_i32_51 dim 1 : vector<8x128xf32>, i32 -> vector<8x128xf32>
    %110 = vector.shape_cast %46 : vector<8x1xi1> to vector<8x1xi1>
    %111 = vector.broadcast %110 : vector<8x1xi1> to vector<8x128xi1>
    %112 = arith.select %111, %109, %108 : vector<8x128xi1>, vector<8x128xf32>
    %113 = vector.extract_strided_slice %112 {offsets = [0, 0], sizes = [8, 8], strides = [1, 1]} : vector<8x128xf32> to vector<8x8xf32>
    %114 = arith.addf %97, %113 : vector<8x8xf32>
    %115 = vector.broadcast %37 : vector<1x8xf32> to vector<8x8xf32>
    %116 = arith.addf %114, %115 : vector<8x8xf32>
    %cst_52 = arith.constant dense<0xFF800000> : vector<8xf32>
    %117 = vector.multi_reduction <maximumf>, %116, %cst_52 [1] : vector<8x8xf32> to vector<8xf32>
    %118 = vector.shape_cast %117 : vector<8xf32> to vector<8x1xf32>
    %119 = vector.broadcast %118 : vector<8x1xf32> to vector<8x8xf32>
    %120 = arith.subf %116, %119 : vector<8x8xf32>
    %121 = math.exp %120 : vector<8x8xf32>
    %cst_53 = arith.constant dense<0.000000e+00> : vector<8xf32>
    %122 = vector.multi_reduction <add>, %121, %cst_53 [1] : vector<8x8xf32> to vector<8xf32>
    %123 = vector.shape_cast %122 : vector<8xf32> to vector<8x1xf32>
    %124 = tpu.reciprocal %123 {approx = true} : vector<8x1xf32> -> vector<8x1xf32>
    %125 = vector.broadcast %124 : vector<8x1xf32> to vector<8x8xf32>
    %126 = arith.mulf %121, %125 : vector<8x8xf32>
    %127 = arith.truncf %126 : vector<8x8xf32> to vector<8x8xbf16>
    %128 = vector.extract_strided_slice %35 {offsets = [0, 8], sizes = [8, 8], strides = [1, 1]} : vector<8x32xbf16> to vector<8x8xbf16>
    %cst_54 = arith.constant dense<0.000000e+00> : vector<8x8xf32>
    %129 = tpu.matmul %127, %128, %cst_54 {dimension_numbers = #tpu.dot_dimension_numbers<[1], [0], [0], [1], [0, 0, 1, 1], [], []>} : vector<8x8xbf16>, vector<8x8xbf16>, vector<8x8xf32> -> vector<8x8xf32>
    %c0_55 = arith.constant 0 : index
    %c8 = arith.constant 8 : index
    %130 = vector.load %arg18[%c0_55, %c8] : memref<8x32xf32, #tpu.memory_space<vmem>>, vector<8x8xf32>
    tpu.vector_store %arg18[%c0_55, %c8], %129 {strides = array<i32>} : memref<8x32xf32, #tpu.memory_space<vmem>>, vector<8x8xf32>,
    %131 = vector.extract_strided_slice %25 {offsets = [0, 16], sizes = [8, 8], strides = [1, 1]} : vector<8x32xbf16> to vector<8x8xbf16>
    %132 = vector.extract_strided_slice %30 {offsets = [0, 16], sizes = [8, 8], strides = [1, 1]} : vector<8x32xbf16> to vector<8x8xbf16>
    %cst_56 = arith.constant dense<0.000000e+00> : vector<8x8xf32>
    %133 = tpu.matmul %131, %132, %cst_56 {dimension_numbers = #tpu.dot_dimension_numbers<[1], [1], [0], [0], [0, 0, 1, 0], [], []>} : vector<8x8xbf16>, vector<8x8xbf16>, vector<8x8xf32> -> vector<8x8xf32>
    %134 = vector.extract_strided_slice %29 {offsets = [0, 16], sizes = [8, 8], strides = [1, 1]} : vector<8x32xbf16> to vector<8x8xbf16>
    %135 = vector.extract_strided_slice %6 {offsets = [0, 16], sizes = [128, 8], strides = [1, 1]} : vector<128x32xbf16> to vector<128x8xbf16>
    %cst_57 = arith.constant dense<0.000000e+00> : vector<8x128xf32>
    %136 = tpu.matmul %134, %135, %cst_57 {dimension_numbers = #tpu.dot_dimension_numbers<[1], [1], [0], [0], [0, 0, 1, 0], [], []>} : vector<8x8xbf16>, vector<128x8xbf16>, vector<8x128xf32> -> vector<8x128xf32>
    %c124_i32_58 = arith.constant 124 : i32
    %137 = tpu.dynamic_rotate %136 by %c124_i32_58 dim 1 : vector<8x128xf32>, i32 -> vector<8x128xf32>
    %138 = vector.shape_cast %58 : vector<8x1xi1> to vector<8x1xi1>
    %139 = vector.broadcast %138 : vector<8x1xi1> to vector<8x128xi1>
    %140 = arith.select %139, %137, %136 : vector<8x128xi1>, vector<8x128xf32>
    %c126_i32_59 = arith.constant 126 : i32
    %141 = tpu.dynamic_rotate %140 by %c126_i32_59 dim 1 : vector<8x128xf32>, i32 -> vector<8x128xf32>
    %142 = vector.shape_cast %52 : vector<8x1xi1> to vector<8x1xi1>
    %143 = vector.broadcast %142 : vector<8x1xi1> to vector<8x128xi1>
    %144 = arith.select %143, %141, %140 : vector<8x128xi1>, vector<8x128xf32>
    %c127_i32_60 = arith.constant 127 : i32
    %145 = tpu.dynamic_rotate %144 by %c127_i32_60 dim 1 : vector<8x128xf32>, i32 -> vector<8x128xf32>
    %146 = vector.shape_cast %46 : vector<8x1xi1> to vector<8x1xi1>
    %147 = vector.broadcast %146 : vector<8x1xi1> to vector<8x128xi1>
    %148 = arith.select %147, %145, %144 : vector<8x128xi1>, vector<8x128xf32>
    %149 = vector.extract_strided_slice %148 {offsets = [0, 0], sizes = [8, 8], strides = [1, 1]} : vector<8x128xf32> to vector<8x8xf32>
    %150 = arith.addf %133, %149 : vector<8x8xf32>
    %151 = vector.broadcast %37 : vector<1x8xf32> to vector<8x8xf32>
    %152 = arith.addf %150, %151 : vector<8x8xf32>
    %cst_61 = arith.constant dense<0xFF800000> : vector<8xf32>
    %153 = vector.multi_reduction <maximumf>, %152, %cst_61 [1] : vector<8x8xf32> to vector<8xf32>
    %154 = vector.shape_cast %153 : vector<8xf32> to vector<8x1xf32>
    %155 = vector.broadcast %154 : vector<8x1xf32> to vector<8x8xf32>
    %156 = arith.subf %152, %155 : vector<8x8xf32>
    %157 = math.exp %156 : vector<8x8xf32>
    %cst_62 = arith.constant dense<0.000000e+00> : vector<8xf32>
    %158 = vector.multi_reduction <add>, %157, %cst_62 [1] : vector<8x8xf32> to vector<8xf32>
    %159 = vector.shape_cast %158 : vector<8xf32> to vector<8x1xf32>
    %160 = tpu.reciprocal %159 {approx = true} : vector<8x1xf32> -> vector<8x1xf32>
    %161 = vector.broadcast %160 : vector<8x1xf32> to vector<8x8xf32>
    %162 = arith.mulf %157, %161 : vector<8x8xf32>
    %163 = arith.truncf %162 : vector<8x8xf32> to vector<8x8xbf16>
    %164 = vector.extract_strided_slice %35 {offsets = [0, 16], sizes = [8, 8], strides = [1, 1]} : vector<8x32xbf16> to vector<8x8xbf16>
    %cst_63 = arith.constant dense<0.000000e+00> : vector<8x8xf32>
    %165 = tpu.matmul %163, %164, %cst_63 {dimension_numbers = #tpu.dot_dimension_numbers<[1], [0], [0], [1], [0, 0, 1, 1], [], []>} : vector<8x8xbf16>, vector<8x8xbf16>, vector<8x8xf32> -> vector<8x8xf32>
    %c0_64 = arith.constant 0 : index
    %c16 = arith.constant 16 : index
    %166 = vector.load %arg18[%c0_64, %c16] : memref<8x32xf32, #tpu.memory_space<vmem>>, vector<8x8xf32>
    tpu.vector_store %arg18[%c0_64, %c16], %165 {strides = array<i32>} : memref<8x32xf32, #tpu.memory_space<vmem>>, vector<8x8xf32>,
    %167 = vector.extract_strided_slice %25 {offsets = [0, 24], sizes = [8, 8], strides = [1, 1]} : vector<8x32xbf16> to vector<8x8xbf16>
    %168 = vector.extract_strided_slice %30 {offsets = [0, 24], sizes = [8, 8], strides = [1, 1]} : vector<8x32xbf16> to vector<8x8xbf16>
    %cst_65 = arith.constant dense<0.000000e+00> : vector<8x8xf32>
    %169 = tpu.matmul %167, %168, %cst_65 {dimension_numbers = #tpu.dot_dimension_numbers<[1], [1], [0], [0], [0, 0, 1, 0], [], []>} : vector<8x8xbf16>, vector<8x8xbf16>, vector<8x8xf32> -> vector<8x8xf32>
    %170 = vector.extract_strided_slice %29 {offsets = [0, 24], sizes = [8, 8], strides = [1, 1]} : vector<8x32xbf16> to vector<8x8xbf16>
    %171 = vector.extract_strided_slice %6 {offsets = [0, 24], sizes = [128, 8], strides = [1, 1]} : vector<128x32xbf16> to vector<128x8xbf16>
    %cst_66 = arith.constant dense<0.000000e+00> : vector<8x128xf32>
    %172 = tpu.matmul %170, %171, %cst_66 {dimension_numbers = #tpu.dot_dimension_numbers<[1], [1], [0], [0], [0, 0, 1, 0], [], []>} : vector<8x8xbf16>, vector<128x8xbf16>, vector<8x128xf32> -> vector<8x128xf32>
    %c124_i32_67 = arith.constant 124 : i32
    %173 = tpu.dynamic_rotate %172 by %c124_i32_67 dim 1 : vector<8x128xf32>, i32 -> vector<8x128xf32>
    %174 = vector.shape_cast %58 : vector<8x1xi1> to vector<8x1xi1>
    %175 = vector.broadcast %174 : vector<8x1xi1> to vector<8x128xi1>
    %176 = arith.select %175, %173, %172 : vector<8x128xi1>, vector<8x128xf32>
    %c126_i32_68 = arith.constant 126 : i32
    %177 = tpu.dynamic_rotate %176 by %c126_i32_68 dim 1 : vector<8x128xf32>, i32 -> vector<8x128xf32>
    %178 = vector.shape_cast %52 : vector<8x1xi1> to vector<8x1xi1>
    %179 = vector.broadcast %178 : vector<8x1xi1> to vector<8x128xi1>
    %180 = arith.select %179, %177, %176 : vector<8x128xi1>, vector<8x128xf32>
    %c127_i32_69 = arith.constant 127 : i32
    %181 = tpu.dynamic_rotate %180 by %c127_i32_69 dim 1 : vector<8x128xf32>, i32 -> vector<8x128xf32>
    %182 = vector.shape_cast %46 : vector<8x1xi1> to vector<8x1xi1>
    %183 = vector.broadcast %182 : vector<8x1xi1> to vector<8x128xi1>
    %184 = arith.select %183, %181, %180 : vector<8x128xi1>, vector<8x128xf32>
    %185 = vector.extract_strided_slice %184 {offsets = [0, 0], sizes = [8, 8], strides = [1, 1]} : vector<8x128xf32> to vector<8x8xf32>
    %186 = arith.addf %169, %185 : vector<8x8xf32>
    %187 = vector.broadcast %37 : vector<1x8xf32> to vector<8x8xf32>
    %188 = arith.addf %186, %187 : vector<8x8xf32>
    %cst_70 = arith.constant dense<0xFF800000> : vector<8xf32>
    %189 = vector.multi_reduction <maximumf>, %188, %cst_70 [1] : vector<8x8xf32> to vector<8xf32>
    %190 = vector.shape_cast %189 : vector<8xf32> to vector<8x1xf32>
    %191 = vector.broadcast %190 : vector<8x1xf32> to vector<8x8xf32>
    %192 = arith.subf %188, %191 : vector<8x8xf32>
    %193 = math.exp %192 : vector<8x8xf32>
    %cst_71 = arith.constant dense<0.000000e+00> : vector<8xf32>
    %194 = vector.multi_reduction <add>, %193, %cst_71 [1] : vector<8x8xf32> to vector<8xf32>
    %195 = vector.shape_cast %194 : vector<8xf32> to vector<8x1xf32>
    %196 = tpu.reciprocal %195 {approx = true} : vector<8x1xf32> -> vector<8x1xf32>
    %197 = vector.broadcast %196 : vector<8x1xf32> to vector<8x8xf32>
    %198 = arith.mulf %193, %197 : vector<8x8xf32>
    %199 = arith.truncf %198 : vector<8x8xf32> to vector<8x8xbf16>
    %200 = vector.extract_strided_slice %35 {offsets = [0, 24], sizes = [8, 8], strides = [1, 1]} : vector<8x32xbf16> to vector<8x8xbf16>
    %cst_72 = arith.constant dense<0.000000e+00> : vector<8x8xf32>
    %201 = tpu.matmul %199, %200, %cst_72 {dimension_numbers = #tpu.dot_dimension_numbers<[1], [0], [0], [1], [0, 0, 1, 1], [], []>} : vector<8x8xbf16>, vector<8x8xbf16>, vector<8x8xf32> -> vector<8x8xf32>
    %c0_73 = arith.constant 0 : index
    %c24 = arith.constant 24 : index
    %202 = vector.load %arg18[%c0_73, %c24] : memref<8x32xf32, #tpu.memory_space<vmem>>, vector<8x8xf32>
    tpu.vector_store %arg18[%c0_73, %c24], %201 {strides = array<i32>} : memref<8x32xf32, #tpu.memory_space<vmem>>, vector<8x8xf32>,
    %c0_74 = arith.constant 0 : index
    %c0_75 = arith.constant 0 : index
    %203 = vector.load %arg18[%c0_74, %c0_75] : memref<8x32xf32, #tpu.memory_space<vmem>>, vector<8x32xf32>
    %204 = arith.truncf %203 : vector<8x32xf32> to vector<8x32xbf16>
    %c0_76 = arith.constant 0 : index
    %c0_77 = arith.constant 0 : index
    %205 = vector.load %arg15[%c0_76, %c0_77] : memref<32x32xbf16, #tpu.memory_space<vmem>>, vector<32x32xbf16>
    %cst_78 = arith.constant dense<0.000000e+00> : vector<8x32xf32>
    %206 = tpu.matmul %204, %205, %cst_78 {dimension_numbers = #tpu.dot_dimension_numbers<[1], [0], [0], [1], [0, 0, 1, 1], [], []>} : vector<8x32xbf16>, vector<32x32xbf16>, vector<8x32xf32> -> vector<8x32xf32>
    %c0_79 = arith.constant 0 : index
    %c0_80 = arith.constant 0 : index
    %207 = vector.load %arg16[%c0_79, %c0_80] : memref<1x32xf32, #tpu.memory_space<vmem>>, vector<1x32xf32>
    %208 = vector.broadcast %207 : vector<1x32xf32> to vector<8x32xf32>
    %209 = arith.addf %206, %208 : vector<8x32xf32>
    %c0_81 = arith.constant 0 : index
    %c0_82 = arith.constant 0 : index
    %c0_83 = arith.constant 0 : index
    %210 = vector.load %arg17[%c0_81, %c0_82, %c0_83] : memref<1x8x32xf32, #tpu.memory_space<vmem>>, vector<1x8x32xf32>
    %211 = vector.shape_cast %210 : vector<1x8x32xf32> to vector<8x32xf32>
    %212 = vector.shape_cast %209 : vector<8x32xf32> to vector<1x8x32xf32>
    tpu.vector_store %arg17[%c0_81, %c0_82, %c0_83], %212 {strides = array<i32>} : memref<1x8x32xf32, #tpu.memory_space<vmem>>, vector<1x8x32xf32>,
    return
  }
  func.func @transform_0(%arg0: i32) -> (i32, i32, i32) {
    %c0_i32 = arith.constant 0 : i32
    %c0_i32_0 = arith.constant 0 : i32
    %c0_i32_1 = arith.constant 0 : i32
    return %arg0, %c0_i32, %c0_i32_0 : i32, i32, i32
  }
  func.func @transform_1(%arg0: i32) -> (i32, i32, i32) {
    %c0_i32 = arith.constant 0 : i32
    %c0_i32_0 = arith.constant 0 : i32
    %c0_i32_1 = arith.constant 0 : i32
    return %arg0, %c0_i32, %c0_i32_0 : i32, i32, i32
  }
  func.func @transform_2(%arg0: i32) -> (i32, i32, i32) {
    %c0_i32 = arith.constant 0 : i32
    %c0_i32_0 = arith.constant 0 : i32
    %c0_i32_1 = arith.constant 0 : i32
    return %arg0, %c0_i32, %c0_i32_0 : i32, i32, i32
  }
  func.func @transform_3(%arg0: i32) -> (i32, i32) {
    %c0_i32 = arith.constant 0 : i32
    %c0_i32_0 = arith.constant 0 : i32
    %c0_i32_1 = arith.constant 0 : i32
    return %c0_i32, %c0_i32_0 : i32, i32
  }
  func.func @transform_4(%arg0: i32) -> (i32, i32, i32) {
    %c0_i32 = arith.constant 0 : i32
    %c0_i32_0 = arith.constant 0 : i32
    %c0_i32_1 = arith.constant 0 : i32
    return %arg0, %c0_i32, %c0_i32_0 : i32, i32, i32
  }
  func.func @transform_5(%arg0: i32) -> (i32, i32, i32) {
    %c0_i32 = arith.constant 0 : i32
    %c0_i32_0 = arith.constant 0 : i32
    %c0_i32_1 = arith.constant 0 : i32
    return %arg0, %c0_i32, %c0_i32_0 : i32, i32, i32
  }
  func.func @transform_6(%arg0: i32) -> (i32, i32) {
    %c0_i32 = arith.constant 0 : i32
    %c0_i32_0 = arith.constant 0 : i32
    %c0_i32_1 = arith.constant 0 : i32
    return %c0_i32, %c0_i32_0 : i32, i32
  }
  func.func @transform_7(%arg0: i32) -> (i32, i32) {
    %c0_i32 = arith.constant 0 : i32
    %c0_i32_0 = arith.constant 0 : i32
    %c0_i32_1 = arith.constant 0 : i32
    return %c0_i32, %c0_i32_0 : i32, i32
  }
  func.func @transform_8(%arg0: i32) -> (i32, i32) {
    %c0_i32 = arith.constant 0 : i32
    %c0_i32_0 = arith.constant 0 : i32
    %c0_i32_1 = arith.constant 0 : i32
    return %c0_i32, %c0_i32_0 : i32, i32
  }
  func.func @transform_9(%arg0: i32) -> (i32, i32) {
    %c0_i32 = arith.constant 0 : i32
    %c0_i32_0 = arith.constant 0 : i32
    %c0_i32_1 = arith.constant 0 : i32
    return %c0_i32, %c0_i32_0 : i32, i32
  }
  func.func @transform_10(%arg0: i32) -> (i32, i32) {
    %c0_i32 = arith.constant 0 : i32
    %c0_i32_0 = arith.constant 0 : i32
    %c0_i32_1 = arith.constant 0 : i32
    return %c0_i32, %c0_i32_0 : i32, i32
  }
  func.func @transform_11(%arg0: i32) -> (i32, i32) {
    %c0_i32 = arith.constant 0 : i32
    %c0_i32_0 = arith.constant 0 : i32
    %c0_i32_1 = arith.constant 0 : i32
    return %c0_i32, %c0_i32_0 : i32, i32
  }
  func.func @transform_12(%arg0: i32) -> (i32, i32) {
    %c0_i32 = arith.constant 0 : i32
    %c0_i32_0 = arith.constant 0 : i32
    %c0_i32_1 = arith.constant 0 : i32
    return %c0_i32, %c0_i32_0 : i32, i32
  }
  func.func @transform_13(%arg0: i32) -> (i32, i32) {
    %c0_i32 = arith.constant 0 : i32
    %c0_i32_0 = arith.constant 0 : i32
    %c0_i32_1 = arith.constant 0 : i32
    return %c0_i32, %c0_i32_0 : i32, i32
  }
  func.func @transform_14(%arg0: i32) -> (i32, i32) {
    %c0_i32 = arith.constant 0 : i32
    %c0_i32_0 = arith.constant 0 : i32
    %c0_i32_1 = arith.constant 0 : i32
    return %c0_i32, %c0_i32_0 : i32, i32
  }
  func.func @transform_15(%arg0: i32) -> (i32, i32) {
    %c0_i32 = arith.constant 0 : i32
    %c0_i32_0 = arith.constant 0 : i32
    %c0_i32_1 = arith.constant 0 : i32
    return %c0_i32, %c0_i32_0 : i32, i32
  }
  func.func @transform_16(%arg0: i32) -> (i32, i32, i32) {
    %c0_i32 = arith.constant 0 : i32
    %c0_i32_0 = arith.constant 0 : i32
    %c0_i32_1 = arith.constant 0 : i32
    return %arg0, %c0_i32, %c0_i32_0 : i32, i32, i32
  }
}

</mosaic_0001>

<bundles_post_ra>
// kernel: tpu_custom_call.1
= control target key start
LH: loop header
LB: loop body
LE: loop exit
PB: predicated region body
PF: predicated region fallthrough
CT: control target
= control target key end

     0   :  { %s2922_s0 = inlined_call_operand.vmem [shape: bf16[2,8,32], index: 0, kind: input, shape index: {}]   ;;  %s2923_s1 = inlined_call_operand.vmem [shape: bf16[2,8,32], index: 1, kind: input, shape index: {}]   ;;  %s2924_s2 = inlined_call_operand.vmem [shape: bf16[2,8,32], index: 2, kind: input, shape index: {}]   ;;  %s2925_s3 = inlined_call_operand.vmem [shape: bf16[128,32], index: 3, kind: input, shape index: {}]   ;;  %s2926_s4 = inlined_call_operand.vmem [shape: f32[2,1,8], index: 4, kind: input, shape index: {}]   ;;  %s2927_s5 = inlined_call_operand.vmem [shape: f32[2,8,1], index: 5, kind: input, shape index: {}]   ;;  %s2928_s6 = inlined_call_operand.vmem [shape: bf16[32,32], index: 6, kind: input, shape index: {}]   ;;  %s2929_s7 = inlined_call_operand.vmem [shape: f32[1,32], index: 7, kind: input, shape index: {}]   ;;  %s2930_s8 = inlined_call_operand.vmem [shape: bf16[32,32], index: 8, kind: input, shape index: {}]   ;;  %s2931_s9 = inlined_call_operand.vmem [shape: f32[1,32], index: 9, kind: input, shape index: {}]   ;;  %s2932_s10 = inlined_call_operand.vmem [shape: bf16[32,32], index: 10, kind: input, shape index: {}]   ;;  %s2933_s11 = inlined_call_operand.vmem [shape: f32[1,32], index: 11, kind: input, shape index: {}]   ;;  %s2934_s12 = inlined_call_operand.vmem [shape: f32[1,32], index: 12, kind: input, shape index: {}]   ;;  %s2935_s13 = inlined_call_operand.vmem [shape: f32[1,32], index: 13, kind: input, shape index: {}]   ;;  %s2936_s14 = inlined_call_operand.vmem [shape: bf16[32,32], index: 14, kind: input, shape index: {}]   ;;  %s2937_s15 = inlined_call_operand.vmem [shape: f32[1,32], index: 15, kind: input, shape index: {}]   ;;  %s2938_s16 = inlined_call_operand.hbm [shape: f32[2,8,32], index: 16, kind: output, shape index: {}]  }
   0x1   :  { %2942 = sst [smem:[#allocation9_spill]] %s2922_s0 }
   0x2   :  { %2943 = sst [smem:[#allocation10_spill]] %s2928_s6 }
   0x3   :  { %2944 = sst [smem:[#allocation11_spill]] %s2930_s8 }
   0x4   :  { %21 = vsyncpa [#allocation4], 0 }
   0x5   :  { %23 = vsyncpa [#allocation4 + $0x1], 0  ;;  %s2422_s21 = smov 0   ;;  %s2424_s22 = smov 0  }
   0x6   :  { %s2426_s23 = smov 0   ;;  %s2428_s24 = smov 0  }
   0x7 LB: > { %2945 = sst [smem:[#allocation6_spill]] %s2318_s23  ;;  %s2443_s25 = sadd.s32 4294967295, %s2322_s24   ;;  %s2322_s24 = sphi %s2428_s24, %s2955_s24   ;;  %s2318_s23 = sphi %s2426_s23, %s2957_s23   ;;  %s2314_s22 = sphi %s2424_s22, %s2959_s22   ;;  %s2310_s21 = sphi %s2422_s21, %s2958_s21  }
   0x8   : > { %s1900_s26 = sadd.s32 4294967294, %s2322_s24   ;;  %s2447_s27 = sadd.s32 1, %s2322_s24  }
   0x9   : > { %2946 = sst [smem:[#allocation7_spill]] %s2447_s27  ;;  %s397_s28 = sadd.s32 1, %s2318_s23 }
   0xa   : > { %s394_s29 = ssub.s32 %s2322_s24, %s2447_s27  ;;  %p407_p0 = scmp.ne.s32.totalorder %s2318_s23, %s2314_s22 }
   0xb   : > { %p395_p1 = scmp.eq.s32.totalorder %s394_s29, 0  ;;  %p408_p2 = scmp.eq.s32.totalorder %s2443_s25, 1 }
   0xc   : > { %p413_p3 = scmp.ne.s32.totalorder %s2314_s22, %s2310_s21  ;;  %p414_p4 = scmp.eq.s32.totalorder %s1900_s26, 1 }
   0xd   : > { %s2458_s30 = scalar_select %p395_p1, %s2318_s23, %s397_s28  }
   0xe   : > { %p2460_p5 = por %p408_p2, %p407_p0  ;;  %p2464_p6 = por %p414_p4, %p413_p3 }
   0xf   : > { %2947 = sst [smem:[#allocation8_spill]] %s2458_s30  ;;  %p1903_p7 = scmp.ge.s32.totalorder %s2322_s24, 1 }
  0x10   : > { %p499_p8 = scmp.lt.s32.totalorder %s2322_s24, 3 }
  0x12   : > { %p500_p9 = pnand %p1903_p7, %p499_p8 }
  0x13   : > { %s2950_s6 = sld [smem:[#allocation10_spill]] (!%p500_p9)  ;;  %v2324_v1 = vmov (!%p500_p9), 0.0   ;;  %s2951_s8 = sld [smem:[#allocation11_spill]] (!%p500_p9)  ;;  %vm2325_vm0 = vmmov (!%p500_p9), 0   ;;  %vm625_vm1 = vcmask (!%p500_p9), 261120   ;;  %v2511_v7 = vld [vmem:[%s2925_s3] sm:$0xff] (!%p500_p9)   ;;  %v829_v58 = vlaneseq (!%p500_p9) }
  0x14   : > { %503 = sbr.rel (%p500_p9) target bundleno = 4534 (0x11b6), region = 84  ;;  %2016 = vmatprep.subr.bf16.mxu0 (!%p500_p9), %v2324_v1  ;;  %2024 = vmatprep.subr.bf16.mxu1 (!%p500_p9), %v2324_v1  ;;  %p563_p10 = scmp.lt.s32.totalorder (!%p500_p9), %s2443_s25, 1  ;;  %vm880_vm2 = vcmask (!%p500_p9), 64512   ;;  %v2239_v8 = vld [vmem:[%s2932_s10] sm:$0xff] (!%p500_p9)   ;;  %v2240_v10 = vld [vmem:[%s2932_s10 + $0x8] sm:$0xff] (!%p500_p9)   ;;  %v2540_v13 = vld [vmem:[%s2925_s3 + $0x10] sm:$0xff] (!%p500_p9)  }
  0x15   : > { %2020 = vmatprep.mubr.msk.bf16.mxu0 (!%p500_p9), %vm2325_vm0, %v2324_v1  ;;  %2028 = vmatprep.mubr.msk.bf16.mxu1 (!%p500_p9), %vm2325_vm0, %v2324_v1  ;;  %v885_v9 = vsel (!%p500_p9), %vm880_vm2, %v2511_v7, 0  ;;  %v2531_v11 = vld [vmem:[%s2925_s3 + $0x8] sm:$0xff] (!%p500_p9)   ;;  %v891_v14 = vsel (!%p500_p9), %vm880_vm2, %v2540_v13, 0  ;;  %v2548_v15 = vld [vmem:[%s2925_s3 + $0x18] sm:$0xff] (!%p500_p9)   ;;  %v2556_v17 = vld [vmem:[%s2925_s3 + $0x20] sm:$0xff] (!%p500_p9)   ;;  %v830_v59 = vshrl.u32 (!%p500_p9), %v829_v58, 7 }
  0x16   : > { %v888_v12 = vsel (!%p500_p9), %vm880_vm2, %v2531_v11, 0  ;;  %v894_v16 = vsel (!%p500_p9), %vm880_vm2, %v2548_v15, 0  ;;  %v897_v18 = vsel (!%p500_p9), %vm880_vm2, %v2556_v17, 0  ;;  %v2564_v19 = vld [vmem:[%s2925_s3 + $0x28] sm:$0xff] (!%p500_p9)   ;;  %v2572_v21 = vld [vmem:[%s2925_s3 + $0x30] sm:$0xff] (!%p500_p9)   ;;  %v2580_v23 = vld [vmem:[%s2925_s3 + $0x38] sm:$0xff] (!%p500_p9)  }
  0x17   : > { %v900_v20 = vsel (!%p500_p9), %vm880_vm2, %v2564_v19, 0  ;;  %v903_v22 = vsel (!%p500_p9), %vm880_vm2, %v2572_v21, 0  ;;  %v906_v24 = vsel (!%p500_p9), %vm880_vm2, %v2580_v23, 0  ;;  %v1909_v26 = vld [vmem:[%s2929_s7] ss:$0 sm:$0xff] (!%p500_p9)  ;;  %v831_v60 = vsub.s32 (!%p500_p9), 7, %v830_v59 }
  0x18   : > { %v1913_v27 = vld [vmem:[%s2931_s9] ss:$0 sm:$0xff] (!%p500_p9)  ;;  %s2328_s27 = smov (!%p500_p9), 127   ;;  %vm1031_vm6 = vcmask (!%p500_p9), 1043456   ;;  %vm1289_vm7 = vcmask (!%p500_p9), 130112   ;;  %vm1500_vm8 = vcmask (!%p500_p9), 195712  }
  0x19   : > { %v2228_v0 = vld [vmem:[%s2950_s6] sm:$0xff] (!%p500_p9)   ;;  %v2230_v3 = vld [vmem:[%s2950_s6 + $0x8] sm:$0xff] (!%p500_p9)   ;;  %s2952_s6 = sld [smem:[#allocation9_spill]] (!%p500_p9)  ;;  %v837_v61 = vshra.s32 (!%p500_p9), %v831_v60, 2  ;;  %vm1711_vm9 = vcmask (!%p500_p9), 261312  }
  0x1a   : > { %v2229_v2 = vld [vmem:[%s2951_s8] sm:$0xff] (!%p500_p9)   ;;  %2017 = vmatpush3.bf16.msra.mxu0 (!%p500_p9), %v2228_v0  ;;  %v2231_v4 = vld [vmem:[%s2951_s8 + $0x8] sm:$0xff] (!%p500_p9)   ;;  %s2326_s8 = smov (!%p500_p9), 124  }
  0x1b   : > { %2025 = vmatpush3.bf16.msra.mxu1 %v2229_v2  ;;  %2018 = vmatprep.subr.bf16.mxu0 %v2324_v1  ;;  %s2492_s20 = scalar_select %p563_p10, %s2443_s25, 1  ;;  %v1922_v29 = vld [vmem:[%s2935_s13] ss:$0 sm:$0xff]  ;;  %v2624_v62 = vand.u32 1, %v837_v61  ;;  %v834_v2 = vshra.s32 %v831_v60, 1 }
  0x1c   : > { %2026 = vmatprep.subr.bf16.mxu1 %v2324_v1  ;;  %v1921_v41 = vld [vmem:[%s2934_s12] ss:$0 sm:$0xff] }
  0x1d   : > { %s2495_s26 = sshll.u32 %s2492_s20, 2  ;;  %vm839_vm3 = vcmp.eq.s32.totalorder %v2624_v62, 1  ;;  %s577_s29 = scalar_lea.vmem %s2926_s4, %s2492_s20 }
  0x1e   : > { %2019 = vmatpush3.bf16.msra.mxu0 %v2230_v3  ;;  %s570_s30 = scalar_lea.vmem %s2923_s1, %s2495_s26  ;;  %s574_s23 = scalar_lea.vmem %s2924_s2, %s2495_s26  ;;  %v2630_v3 = vand.u32 1, %v834_v2 }
  0x1f   : > { %2027 = vmatpush3.bf16.msra.mxu1 %v2231_v4  ;;  %s566_s18 = scalar_lea.vmem %s2952_s6, %s2495_s26  ;;  %2032 = vmatprep.subr.bf16.mxu0 %v2324_v1  ;;  %v584_v6 = vld [vmem:[%s570_s30] sm:$0xf]  ;;  %s1908_s19 = sshll.u32 %s2492_s20, 3 }
  0x20   : > { %v583_v5 = vld [vmem:[%s566_s18] sm:$0xf]  ;;  %2040 = vmatprep.subr.bf16.mxu1 %v2324_v1  ;;  %vm836_vm4 = vcmp.eq.s32.totalorder %v2630_v3, 1  ;;  %s2329_s18 = smov 120   ;;  %s581_s30 = scalar_lea.vmem %s2927_s5, %s1908_s19 }
  0x21   : > { %2021 = vmatmul.mubr.msk.bf16.vlgmr.msra.gmra.mrb[0].mxu0 %vm625_vm1, %v583_v5  ;;  %v585_v25 = vld [vmem:[%s574_s23] sm:$0xf]  ;;  %s2327_s23 = smov 126   ;;  %s560_s20 = sand.u32 1, %s2314_s22  }
  0x22   : > { %2029 = vmatmul.mubr.msk.bf16.vlgmr.msra.gmra.mrb[0].mxu1 %vm625_vm1, %v584_v6  ;;  %2036 = vmatprep.mubr.msk.bf16.mxu0 %vm2325_vm0, %v2324_v1  ;;  %v832_v6 = vand.u32 1, %v831_v60  ;;  %s1904_s28 = sshll.u32 %s560_s20, 3 }
  0x23   : > { %2056 = vmatprep.mubr.msk.bf16.mxu1 %vm2325_vm0, %v2324_v1  ;;  %2033 = vmatpush3.bf16.msra.mxu0 %v2239_v8 }
  0x24   : > { %2034 = vmatprep.subr.bf16.mxu0 %v2324_v1  ;;  %vm2636_vm5 = vcmp.eq.s32.totalorder %v832_v6, 1 }
  0x27   : > { %2035 = vmatpush3.bf16.msra.mxu0 %v2240_v10 }
  0x28   : > { %2041 = vmatpush3.bf16.xpose.msra.mxu1 %v885_v9  ;;  %2060 = vmatprep.subr.bf16.mxu0 %v2324_v1 }
  0x29   : > { %2042 = vmatprep.subr.bf16.mxu1 %v2324_v1 }
  0x2a   : > { %2037 = vmatmul.mubr.msk.bf16.vlgmr.msra.gmra.mrb[4].mxu0 %vm625_vm1, %v585_v25 }
  0x2b   : > { %2062 = vmatprep.mubr.msk.bf16.mxu0 %vm2325_vm0, %v2324_v1 }
  0x30   : > { %2043 = vmatpush3.bf16.xpose.msra.mxu1 %v888_v12  ;;  %v2646_v12 = vld [vmem:[%s577_s29] ss:$0 sm:$0xff]  ;;  %s2331_s29 = smov 112  }
  0x31   : > { %2044 = vmatprep.subr.bf16.mxu1 %v2324_v1 }
  0x38   : > { %2045 = vmatpush3.bf16.xpose.msra.mxu1 %v891_v14 }
  0x39   : > { %2046 = vmatprep.subr.bf16.mxu1 %v2324_v1 }
  0x40   : > { %2047 = vmatpush3.bf16.xpose.msra.mxu1 %v894_v16 }
  0x41   : > { %2048 = vmatprep.subr.bf16.mxu1 %v2324_v1 }
  0x48   : > { %2049 = vmatpush3.bf16.xpose.msra.mxu1 %v897_v18 }
  0x49   : > { %2050 = vmatprep.subr.bf16.mxu1 %v2324_v1 }
  0x50   : > { %2051 = vmatpush3.bf16.xpose.msra.mxu1 %v900_v20  ;;  %v2330_v20 = vmov 0  }
  0x51   : > { %2052 = vmatprep.subr.bf16.mxu1 %v2324_v1  ;;  %2227 = vset.pattern.permute.xlu0 %v2330_v20 }
  0x58   : > { %2053 = vmatpush3.bf16.xpose.msra.mxu1 %v903_v22 }
  0x59   : > { %2054 = vmatprep.subr.bf16.mxu1 %v2324_v1 }
  0x60   : > { %2055 = vmatpush3.bf16.xpose.msra.mxu1 %v906_v24 }
  0x61   : > { %2092 = vmatprep.subr.bf16.mxu1 %v2324_v1 }
  0xf4   : > { %v663_v28 = vpop.f32.mrb[0].mxu0 }
  0xf5   : > { %v664_v30 = vadd.f32 %v1909_v26, %v663_v28  ;;  %v729_v31 = vpop.f32.mrb[0].mxu1  ;;  %v2022_v32 = vpop.f32.mrb[1].mxu0 }
  0xf6   : > { %v730_v33 = vadd.f32 %v1913_v27, %v729_v31  ;;  %v666_v34 = vpop.f32.mrb[2].mxu0  ;;  %v2030_v35 = vpop.f32.mrb[1].mxu1 }
  0xf7   : > { %v817_v36 = vadd.f32 %v1922_v29, %v664_v30  ;;  %v2023_v37 = vpop.f32.mrb[3].mxu0  ;;  %v732_v38 = vpop.f32.mrb[2].mxu1  ;;  %v808_v44 = vadd.f32 %v1921_v41, %v664_v30  ;;  %v1917_v41 = vld [vmem:[%s2933_s11] ss:$0 sm:$0xff] }
  0xf8   : > { %v2601_v39 = vpack.c.bf16 %v730_v33, %v730_v33  ;;  %v2031_v40 = vpop.f32.mrb[3].mxu1  ;;  %v820_v37 = vld [vmem:[%s581_s30] sm:$0xff]  ;;  %s2335_s30 = smov 24  }
  0xf9   : > { %v2606_v42 = vpack.c.bf16 %v817_v36, %v817_v36  ;;  %v2615_v45 = vpack.c.bf16 %v808_v44, %v808_v44 }
  0xfa   : > { %v967_v43 = vsel %vm880_vm2, %v2601_v39, 0 }
  0xfb   : > { %2061 = vmatpush3.bf16.xpose.msra.mxu0 %v967_v43  ;;  %2057 = vmatmul.mubr.msk.bf16.vlgmr.msra.gmra.mrb[4].mxu1 %vm880_vm2, %v2606_v42 }
  0xfc   : > { %2066 = vmatprep.subr.bf16.mxu0 %v2324_v1  ;;  %2094 = vmatprep.mubr.msk.bf16.mxu1 %vm2325_vm0, %v2324_v1 }
  0xfd   : > { %v2621_v46 = vpop.f32.mrb[4].mxu0 }
  0xfe   : > { %v2038_v47 = vpop.f32.mrb[5].mxu0  ;;  %v796_v43 = vadd.f32 %v1917_v41, %v2621_v46 }
  0xff   : > { %v798_v48 = vpop.f32.mrb[6].mxu0 }
 0x100   : > { %v2039_v49 = vpop.f32.mrb[7].mxu0 }
 0x102   : > { %2063 = vmatmul.mubr.msk.bf16.vlgmr.msra.gmra.mrb[8].mxu0 %vm880_vm2, %v2615_v45 }
 0x103   : > { %2068 = vmatprep.mubr.msk.bf16.mxu0 %vm2325_vm0, %v2324_v1 }
 0x1ce   : > { %v942_v50 = vpop.f32.mrb[4].mxu1 }
 0x1cf   : > { %948 = vrot.lane.b32.xlu0 %v942_v50, %s2326_s8  ;;  %v2058_v51 = vpop.f32.mrb[5].mxu1 }
 0x1d0   : > { %v945_v52 = vpop.f32.mrb[6].mxu1 }
 0x1d1   : > { %v2059_v53 = vpop.f32.mrb[7].mxu1 }
 0x1d5   : > { %v1003_v54 = vpop.f32.mrb[8].mxu0 }
 0x1d6   : > { %v2064_v55 = vpop.f32.mrb[9].mxu0 }
 0x1d7   : > { %v1006_v56 = vpop.f32.mrb[10].mxu0 }
 0x1d8   : > { %v2065_v57 = vpop.f32.mrb[11].mxu0 }
 0x241   : > { %v949_v63 = vpop.permute.xlu0 %948 }
 0x242   : > { %v952_v0 = vsel %vm839_vm3, %v949_v63, %v942_v50 }
 0x243   : > { %953 = vrot.lane.b32.xlu0 %v952_v0, %s2327_s23 }
 0x2b5   : > { %v954_v4 = vpop.permute.xlu0 %953 }
 0x2b6   : > { %v957_v5 = vsel %vm836_vm4, %v954_v4, %v952_v0 }
 0x2b7   : > { %958 = vrot.lane.b32.xlu1 %v957_v5, %s2328_s27 }
 0x329   : > { %v959_v9 = vpop.permute.xlu1 %958 }
 0x32a   : > { %v962_v10 = vsel %vm2636_vm5, %v959_v9, %v957_v5 }
 0x32b   : > { %v1004_v14 = vadd.f32 %v1003_v54, %v962_v10 }
 0x32d   : > { %v1015_v16 = vadd.f32 %v2646_v12, %v1004_v14 }
 0x32f   : > { %v1016_v18 = vsel %vm880_vm2, %v1015_v16, -inf }
 0x330   : > { %1017 = vmax.xlane.f32.xlu1 %v1016_v18 }
 0x341   : > { %1079 = vrot.lane.b32.xlu1 %v2511_v7, %s2329_s18 }
 0x345   : > { %1081 = vrot.lane.b32.xlu1 %v2531_v11, %s2329_s18 }
 0x349   : > { %1083 = vrot.lane.b32.xlu1 %v2540_v13, %s2329_s18 }
 0x34d   : > { %1085 = vrot.lane.b32.xlu1 %v2548_v15, %s2329_s18 }
 0x351   : > { %1087 = vrot.lane.b32.xlu1 %v2556_v17, %s2329_s18 }
 0x355   : > { %1089 = vrot.lane.b32.xlu1 %v2564_v19, %s2329_s18 }
 0x359   : > { %1091 = vrot.lane.b32.xlu1 %v2572_v21, %s2329_s18 }
 0x35d   : > { %1093 = vrot.lane.b32.xlu1 %v2580_v23, %s2329_s18 }
 0x361   : > { %1175 = vrot.lane.b32.xlu1 %v2601_v39, %s2329_s18 }
 0x3bd   : > { %v1018_v22 = vpop.xlane.xlu1 %1017 }
 0x3be   : > { %v1019_v24 = vsub.f32 %v1015_v16, %v1018_v22 }
 0x3c0   : > { %v1020_v25 = vmul.f32 1.442695, %v1019_v24 }
 0x3c1   : > { %v1080_v26 = vpop.permute.xlu1 %1079 }
 0x3c2   : > { %2244 = vpow2.f32 %v1020_v25  ;;  %v1099_v46 = vsel %vm880_vm2, %v1080_v26, 0 }
 0x3c5   : > { %v1082_v27 = vpop.permute.xlu1 %1081 }
 0x3c6   : > { %v1102_v55 = vsel %vm880_vm2, %v1082_v27, 0 }
 0x3c9   : > { %v1084_v28 = vpop.permute.xlu1 %1083 }
 0x3ca   : > { %v1105_v56 = vsel %vm880_vm2, %v1084_v28, 0 }
 0x3cc   : > { %v2245_v29 = vpop.eup %2244 }
 0x3cd   : > { %v1086_v30 = vpop.permute.xlu1 %1085  ;;  %v1022_v31 = vsel %vm880_vm2, %v2245_v29, 0.0 }
 0x3ce   : > { %1023 = vadd.xlane.f32.xlu0 %v1022_v31  ;;  %v1108_v57 = vsel %vm880_vm2, %v1086_v30, 0 }
 0x3d1   : > { %v1088_v32 = vpop.permute.xlu1 %1087 }
 0x3d2   : > { %v1111_v58 = vsel %vm880_vm2, %v1088_v32, 0 }
 0x3d5   : > { %v1090_v33 = vpop.permute.xlu1 %1089 }
 0x3d6   : > { %v1114_v59 = vsel %vm880_vm2, %v1090_v33, 0 }
 0x3d9   : > { %v1092_v34 = vpop.permute.xlu1 %1091 }
 0x3da   : > { %v1117_v60 = vsel %vm880_vm2, %v1092_v34, 0 }
 0x3dd   : > { %v1094_v35 = vpop.permute.xlu1 %1093 }
 0x3de   : > { %v1120_v61 = vsel %vm880_vm2, %v1094_v35, 0 }
 0x3e1   : > { %v1176_v36 = vpop.permute.xlu1 %1175 }
 0x3e2   : > { %v1181_v38 = vsel %vm880_vm2, %v1176_v36, 0 }
 0x3e3   : > { %2093 = vmatpush3.bf16.xpose.msra.mxu1 %v1181_v38 }
 0x3e4   : > { %823 = vperm.xlu0 %2227, %v820_v37   ;;  %2098 = vmatprep.subr.bf16.mxu1 %v2324_v1 }
 0x3e8   : > { %1077 = vrot.lane.b32.xlu0 %v2606_v42, %s2329_s18 }
 0x3ec   : > { %1172 = vrot.lane.b32.xlu0 %v2615_v45, %s2329_s18 }
 0x45b   : > { %v1024_v40 = vpop.xlane.xlu0 %1023 }
 0x45c   : > { %2246 = vrcp.f32 %v1024_v40 }
 0x463   : > { %v824_v44 = vpop.permute.xlu0 %823 }
 0x464   : > { %v826_v47 = vmul.f32 %v824_v44, %v796_v43 }
 0x466   : > { %v2247_v48 = vpop.eup %2246  ;;  %v2683_v49 = vpack.c.bf16 %v826_v47, %v826_v47 }
 0x467   : > { %v1026_v50 = vmul.f32 %v2247_v48, %v2245_v29  ;;  %v1078_v51 = vpop.permute.xlu0 %1077 }
 0x468   : > { %v1033_v52 = vsel %vm1031_vm6, %v2683_v49, 0 }
 0x469   : > { %2067 = vmatpush3.bf16.msra.mxu0 %v1033_v52  ;;  %v1027_v53 = vpack.c.bf16 %v1026_v50, %v1026_v50 }
 0x46a   : > { %2072 = vmatprep.subr.bf16.mxu0 %v2324_v1 }
 0x46b   : > { %v1173_v54 = vpop.permute.xlu0 %1172 }
 0x46c   : > { %2069 = vmatmul.mubr.msk.bf16.vlgmr.msra.gmra.mrb[12].mxu0 %vm880_vm2, %v1027_v53  ;;  %2095 = vmatmul.mubr.msk.bf16.vlgmr.msra.gmra.mrb[8].mxu1 %vm880_vm2, %v1173_v54 }
 0x46d   : > { %2088 = vmatprep.mubr.msk.bf16.mxu0 %vm2325_vm0, %v2324_v1  ;;  %2100 = vmatprep.mubr.msk.bf16.mxu1 %vm2325_vm0, %v2324_v1 }
 0x472   : > { %2073 = vmatpush3.bf16.xpose.msra.mxu0 %v1099_v46 }
 0x473   : > { %2074 = vmatprep.subr.bf16.mxu0 %v2324_v1 }
 0x47a   : > { %2075 = vmatpush3.bf16.xpose.msra.mxu0 %v1102_v55 }
 0x47b   : > { %2076 = vmatprep.subr.bf16.mxu0 %v2324_v1 }
 0x482   : > { %2077 = vmatpush3.bf16.xpose.msra.mxu0 %v1105_v56 }
 0x483   : > { %2078 = vmatprep.subr.bf16.mxu0 %v2324_v1 }
 0x48a   : > { %2079 = vmatpush3.bf16.xpose.msra.mxu0 %v1108_v57 }
 0x48b   : > { %2080 = vmatprep.subr.bf16.mxu0 %v2324_v1 }
 0x492   : > { %2081 = vmatpush3.bf16.xpose.msra.mxu0 %v1111_v58 }
 0x493   : > { %2082 = vmatprep.subr.bf16.mxu0 %v2324_v1 }
 0x49a   : > { %2083 = vmatpush3.bf16.xpose.msra.mxu0 %v1114_v59 }
 0x49b   : > { %2084 = vmatprep.subr.bf16.mxu0 %v2324_v1 }
 0x4a2   : > { %2085 = vmatpush3.bf16.xpose.msra.mxu0 %v1117_v60 }
 0x4a3   : > { %2086 = vmatprep.subr.bf16.mxu0 %v2324_v1 }
 0x4aa   : > { %2087 = vmatpush3.bf16.xpose.msra.mxu0 %v1120_v61 }
 0x4ab   : > { %2124 = vmatprep.subr.bf16.mxu0 %v2324_v1 }
 0x4b1   : > { %2089 = vmatmul.mubr.msk.bf16.vlgmr.msra.gmra.mrb[16].mxu0 %vm880_vm2, %v1078_v51 }
 0x4b2   : > { %2126 = vmatprep.mubr.msk.bf16.mxu0 %vm2325_vm0, %v2324_v1 }
 0x53f   : > { %v1069_v63 = vpop.f32.mrb[12].mxu0  ;;  %v1217_v0 = vpop.f32.mrb[8].mxu1 }
 0x540   : > { %1075 = vst.msk [vmem:[#allocation2] sm:$0xff] %vm880_vm2, %v1069_v63  ;;  %v2070_v2 = vpop.f32.mrb[13].mxu0  ;;  %v2096_v4 = vpop.f32.mrb[9].mxu1 }
 0x541   : > { %v1072_v5 = vpop.f32.mrb[14].mxu0  ;;  %v1220_v6 = vpop.f32.mrb[10].mxu1 }
 0x542   : > { %v2071_v9 = vpop.f32.mrb[15].mxu0  ;;  %v2097_v10 = vpop.f32.mrb[11].mxu1 }
 0x584   : > { %v1156_v14 = vpop.f32.mrb[16].mxu0 }
 0x585   : > { %1162 = vrot.lane.b32.xlu1 %v1156_v14, %s2326_s8  ;;  %v2090_v16 = vpop.f32.mrb[17].mxu0 }
 0x586   : > { %v1159_v18 = vpop.f32.mrb[18].mxu0 }
 0x587   : > { %v2091_v20 = vpop.f32.mrb[19].mxu0 }
 0x5f7   : > { %v1163_v22 = vpop.permute.xlu1 %1162 }
 0x5f8   : > { %v1164_v24 = vsel %vm839_vm3, %v1163_v22, %v1156_v14 }
 0x5f9   : > { %1165 = vrot.lane.b32.xlu0 %v1164_v24, %s2327_s23 }
 0x66b   : > { %v1166_v25 = vpop.permute.xlu0 %1165 }
 0x66c   : > { %v1167_v26 = vsel %vm836_vm4, %v1166_v25, %v1164_v24 }
 0x66d   : > { %1168 = vrot.lane.b32.xlu1 %v1167_v26, %s2328_s27 }
 0x6df   : > { %v1169_v27 = vpop.permute.xlu1 %1168 }
 0x6e0   : > { %v1170_v28 = vsel %vm2636_vm5, %v1169_v27, %v1167_v26 }
 0x6e1   : > { %v1218_v29 = vadd.f32 %v1217_v0, %v1170_v28 }
 0x6e3   : > { %v1223_v30 = vadd.f32 %v2646_v12, %v1218_v29 }
 0x6e5   : > { %v1224_v31 = vsel %vm880_vm2, %v1223_v30, -inf }
 0x6e6   : > { %1225 = vmax.xlane.f32.xlu0 %v1224_v31 }
 0x6fc   : > { %1237 = vrot.lane.b32.xlu0 %v2683_v49, %s2329_s18  ;;  %s2332_s18 = smov 104  }
 0x700   : > { %1295 = vrot.lane.b32.xlu0 %v2531_v11, %s2331_s29 }
 0x704   : > { %1299 = vrot.lane.b32.xlu0 %v2548_v15, %s2331_s29 }
 0x708   : > { %1303 = vrot.lane.b32.xlu0 %v2564_v19, %s2331_s29 }
 0x70c   : > { %1307 = vrot.lane.b32.xlu0 %v2580_v23, %s2331_s29 }
 0x710   : > { %1387 = vrot.lane.b32.xlu0 %v2601_v39, %s2331_s29 }
 0x773   : > { %v1226_v32 = vpop.xlane.xlu0 %1225 }
 0x774   : > { %v1227_v33 = vsub.f32 %v1223_v30, %v1226_v32 }
 0x776   : > { %v1228_v34 = vmul.f32 1.442695, %v1227_v33 }
 0x777   : > { %v1238_v35 = vpop.permute.xlu0 %1237 }
 0x778   : > { %2248 = vpow2.f32 %v1228_v34  ;;  %v1243_v36 = vsel %vm1031_vm6, %v1238_v35, 0 }
 0x779   : > { %2099 = vmatpush3.bf16.msra.mxu1 %v1243_v36 }
 0x77a   : > { %2104 = vmatprep.subr.bf16.mxu1 %v2324_v1 }
 0x77b   : > { %v1296_v37 = vpop.permute.xlu0 %1295 }
 0x77c   : > { %v1316_v59 = vsel %vm880_vm2, %v1296_v37, 0 }
 0x77f   : > { %v1300_v38 = vpop.permute.xlu0 %1299 }
 0x780   : > { %v1322_v63 = vsel %vm880_vm2, %v1300_v38, 0 }
 0x782   : > { %v2249_v40 = vpop.eup %2248 }
 0x783   : > { %v1304_v41 = vpop.permute.xlu0 %1303  ;;  %v1230_v43 = vsel %vm880_vm2, %v2249_v40, 0.0 }
 0x784   : > { %1231 = vadd.xlane.f32.xlu1 %v1230_v43  ;;  %v1328_v2 = vsel %vm880_vm2, %v1304_v41, 0 }
 0x787   : > { %v1308_v44 = vpop.permute.xlu0 %1307 }
 0x788   : > { %v1334_v5 = vsel %vm880_vm2, %v1308_v44, 0 }
 0x78b   : > { %v1388_v47 = vpop.permute.xlu0 %1387 }
 0x78c   : > { %v1393_v48 = vsel %vm880_vm2, %v1388_v47, 0 }
 0x78d   : > { %2125 = vmatpush3.bf16.xpose.msra.mxu0 %v1393_v48 }
 0x78e   : > { %2130 = vmatprep.subr.bf16.mxu0 %v2324_v1 }
 0x795   : > { %1293 = vrot.lane.b32.xlu1 %v2511_v7, %s2331_s29 }
 0x799   : > { %1297 = vrot.lane.b32.xlu1 %v2540_v13, %s2331_s29 }
 0x79d   : > { %1301 = vrot.lane.b32.xlu1 %v2556_v17, %s2331_s29 }
 0x7a1   : > { %1305 = vrot.lane.b32.xlu1 %v2572_v21, %s2331_s29 }
 0x7a5   : > { %1291 = vrot.lane.b32.xlu1 %v2606_v42, %s2331_s29 }
 0x7a9   : > { %1385 = vrot.lane.b32.xlu1 %v2615_v45, %s2331_s29 }
 0x811   : > { %v1232_v50 = vpop.xlane.xlu1 %1231 }
 0x812   : > { %2250 = vrcp.f32 %v1232_v50 }
 0x815   : > { %v1294_v51 = vpop.permute.xlu1 %1293 }
 0x816   : > { %v1313_v55 = vsel %vm880_vm2, %v1294_v51, 0 }
 0x819   : > { %v1298_v52 = vpop.permute.xlu1 %1297 }
 0x81a   : > { %v1319_v61 = vsel %vm880_vm2, %v1298_v52, 0 }
 0x81c   : > { %v2251_v53 = vpop.eup %2250 }
 0x81d   : > { %v1234_v54 = vmul.f32 %v2251_v53, %v2249_v40  ;;  %v1302_v46 = vpop.permute.xlu1 %1301 }
 0x81e   : > { %v1325_v0 = vsel %vm880_vm2, %v1302_v46, 0 }
 0x81f   : > { %v1235_v56 = vpack.c.bf16 %v1234_v54, %v1234_v54 }
 0x821   : > { %v1306_v57 = vpop.permute.xlu1 %1305  ;;  %2101 = vmatmul.mubr.msk.bf16.vlgmr.msra.gmra.mrb[12].mxu1 %vm880_vm2, %v1235_v56 }
 0x822   : > { %2105 = vmatpush3.bf16.xpose.msra.mxu1 %v1313_v55  ;;  %2120 = vmatprep.mubr.msk.bf16.mxu1 %vm2325_vm0, %v2324_v1  ;;  %v1331_v4 = vsel %vm880_vm2, %v1306_v57, 0 }
 0x823   : > { %2106 = vmatprep.subr.bf16.mxu1 %v2324_v1 }
 0x825   : > { %v1292_v58 = vpop.permute.xlu1 %1291 }
 0x829   : > { %v1386_v60 = vpop.permute.xlu1 %1385 }
 0x82a   : > { %2107 = vmatpush3.bf16.xpose.msra.mxu1 %v1316_v59  ;;  %2127 = vmatmul.mubr.msk.bf16.vlgmr.msra.gmra.mrb[20].mxu0 %vm880_vm2, %v1386_v60 }
 0x82b   : > { %2108 = vmatprep.subr.bf16.mxu1 %v2324_v1  ;;  %2132 = vmatprep.mubr.msk.bf16.mxu0 %vm2325_vm0, %v2324_v1 }
 0x832   : > { %2109 = vmatpush3.bf16.xpose.msra.mxu1 %v1319_v61 }
 0x833   : > { %2110 = vmatprep.subr.bf16.mxu1 %v2324_v1 }
 0x83a   : > { %2111 = vmatpush3.bf16.xpose.msra.mxu1 %v1322_v63 }
 0x83b   : > { %2112 = vmatprep.subr.bf16.mxu1 %v2324_v1 }
 0x842   : > { %2113 = vmatpush3.bf16.xpose.msra.mxu1 %v1325_v0 }
 0x843   : > { %2114 = vmatprep.subr.bf16.mxu1 %v2324_v1 }
 0x84a   : > { %2115 = vmatpush3.bf16.xpose.msra.mxu1 %v1328_v2 }
 0x84b   : > { %2116 = vmatprep.subr.bf16.mxu1 %v2324_v1 }
 0x852   : > { %2117 = vmatpush3.bf16.xpose.msra.mxu1 %v1331_v4 }
 0x853   : > { %2118 = vmatprep.subr.bf16.mxu1 %v2324_v1 }
 0x85a   : > { %2119 = vmatpush3.bf16.xpose.msra.mxu1 %v1334_v5 }
 0x85b   : > { %2156 = vmatprep.subr.bf16.mxu1 %v2324_v1 }
 0x861   : > { %2121 = vmatmul.mubr.msk.bf16.vlgmr.msra.gmra.mrb[16].mxu1 %vm880_vm2, %v1292_v58 }
 0x862   : > { %2158 = vmatprep.mubr.msk.bf16.mxu1 %vm2325_vm0, %v2324_v1 }
 0x8f4   : > { %v2779_v6 = vpop.f32.mrb[12].mxu1 }
 0x8f5   : > { %v2102_v9 = vpop.f32.mrb[13].mxu1 }
 0x8f6   : > { %v1282_v10 = vpop.f32.mrb[14].mxu1 }
 0x8f7   : > { %v2103_v14 = vpop.f32.mrb[15].mxu1 }
 0x8fd   : > { %v1429_v16 = vpop.f32.mrb[20].mxu0 }
 0x8fe   : > { %v2128_v18 = vpop.f32.mrb[21].mxu0 }
 0x8ff   : > { %v1432_v20 = vpop.f32.mrb[22].mxu0 }
 0x900   : > { %v2129_v22 = vpop.f32.mrb[23].mxu0 }
 0x934   : > { %v1370_v24 = vpop.f32.mrb[16].mxu1 }
 0x935   : > { %1376 = vrot.lane.b32.xlu0 %v1370_v24, %s2326_s8  ;;  %v2122_v25 = vpop.f32.mrb[17].mxu1 }
 0x936   : > { %v1373_v26 = vpop.f32.mrb[18].mxu1 }
 0x937   : > { %v2123_v27 = vpop.f32.mrb[19].mxu1 }
 0x9a7   : > { %v1377_v28 = vpop.permute.xlu0 %1376 }
 0x9a8   : > { %v1378_v29 = vsel %vm839_vm3, %v1377_v28, %v1370_v24 }
 0x9a9   : > { %1379 = vrot.lane.b32.xlu1 %v1378_v29, %s2327_s23 }
 0xa1b   : > { %v1380_v30 = vpop.permute.xlu1 %1379 }
 0xa1c   : > { %v1381_v31 = vsel %vm836_vm4, %v1380_v30, %v1378_v29 }
 0xa1d   : > { %1382 = vrot.lane.b32.xlu0 %v1381_v31, %s2328_s27 }
 0xa8f   : > { %v1383_v32 = vpop.permute.xlu0 %1382 }
 0xa90   : > { %v1384_v33 = vsel %vm2636_vm5, %v1383_v32, %v1381_v31 }
 0xa91   : > { %v1430_v34 = vadd.f32 %v1429_v16, %v1384_v33 }
 0xa93   : > { %v1435_v35 = vadd.f32 %v2646_v12, %v1430_v34 }
 0xa95   : > { %v1436_v36 = vsel %vm880_vm2, %v1435_v35, -inf }
 0xa96   : > { %1437 = vmax.xlane.f32.xlu1 %v1436_v36 }
 0xaa7   : > { %1504 = vrot.lane.b32.xlu1 %v2511_v7, %s2332_s18 }
 0xaab   : > { %1506 = vrot.lane.b32.xlu1 %v2531_v11, %s2332_s18 }
 0xaaf   : > { %1510 = vrot.lane.b32.xlu1 %v2548_v15, %s2332_s18 }
 0xab3   : > { %1514 = vrot.lane.b32.xlu1 %v2564_v19, %s2332_s18 }
 0xab7   : > { %1518 = vrot.lane.b32.xlu1 %v2580_v23, %s2332_s18 }
 0xabb   : > { %1598 = vrot.lane.b32.xlu1 %v2601_v39, %s2332_s18 }
 0xb23   : > { %v1438_v37 = vpop.xlane.xlu1 %1437 }
 0xb24   : > { %v1439_v38 = vsub.f32 %v1435_v35, %v1438_v37 }
 0xb26   : > { %v1440_v40 = vmul.f32 1.442695, %v1439_v38 }
 0xb27   : > { %v1505_v41 = vpop.permute.xlu1 %1504 }
 0xb28   : > { %2252 = vpow2.f32 %v1440_v40 }
 0xb2b   : > { %v1507_v7 = vpop.permute.xlu1 %1506 }
 0xb2c   : > { %v1527_v54 = vsel %vm880_vm2, %v1507_v7, 0 }
 0xb2f   : > { %v1511_v43 = vpop.permute.xlu1 %1510 }
 0xb30   : > { %v1533_v56 = vsel %vm880_vm2, %v1511_v43, 0 }
 0xb32   : > { %v2253_v11 = vpop.eup %2252 }
 0xb33   : > { %v1515_v44 = vpop.permute.xlu1 %1514  ;;  %v1442_v15 = vsel %vm880_vm2, %v2253_v11, 0.0 }
 0xb34   : > { %1443 = vadd.xlane.f32.xlu0 %v1442_v15  ;;  %v1539_v58 = vsel %vm880_vm2, %v1515_v44, 0 }
 0xb37   : > { %v1519_v47 = vpop.permute.xlu1 %1518 }
 0xb38   : > { %v1545_v60 = vsel %vm880_vm2, %v1519_v47, 0 }
 0xb3b   : > { %v1599_v19 = vpop.permute.xlu1 %1598 }
 0xb3c   : > { %v1604_v48 = vsel %vm880_vm2, %v1599_v19, 0 }
 0xb3d   : > { %2157 = vmatpush3.bf16.xpose.msra.mxu1 %v1604_v48 }
 0xb3e   : > { %2162 = vmatprep.subr.bf16.mxu1 %v2324_v1 }
 0xb4a   : > { %1448 = vrot.lane.b32.xlu0 %v2683_v49, %s2331_s29 }
 0xb4e   : > { %1508 = vrot.lane.b32.xlu0 %v2540_v13, %s2332_s18 }
 0xb52   : > { %1512 = vrot.lane.b32.xlu0 %v2556_v17, %s2332_s18 }
 0xb56   : > { %1516 = vrot.lane.b32.xlu0 %v2572_v21, %s2332_s18  ;;  %v1524_v21 = vsel %vm880_vm2, %v1505_v41, 0  ;;  %v2243_v41 = vld [vmem:[%s2936_s14 + $0x8] sm:$0xff]  }
 0xb5a   : > { %1502 = vrot.lane.b32.xlu0 %v2606_v42, %s2332_s18 }
 0xb5e   : > { %1596 = vrot.lane.b32.xlu0 %v2615_v45, %s2332_s18 }
 0xbc1   : > { %v1444_v23 = vpop.xlane.xlu0 %1443 }
 0xbc2   : > { %2254 = vrcp.f32 %v1444_v23 }
 0xbc5   : > { %v1449_v39 = vpop.permute.xlu0 %1448 }
 0xbc6   : > { %v1454_v50 = vsel %vm1031_vm6, %v1449_v39, 0 }
 0xbc7   : > { %2131 = vmatpush3.bf16.msra.mxu0 %v1454_v50 }
 0xbc8   : > { %2136 = vmatprep.subr.bf16.mxu0 %v2324_v1 }
 0xbc9   : > { %v1509_v13 = vpop.permute.xlu0 %1508 }
 0xbca   : > { %v1530_v55 = vsel %vm880_vm2, %v1509_v13, 0 }
 0xbcc   : > { %v2255_v51 = vpop.eup %2254 }
 0xbcd   : > { %v1446_v17 = vmul.f32 %v2255_v51, %v2253_v11  ;;  %v1513_v52 = vpop.permute.xlu0 %1512 }
 0xbce   : > { %v1536_v57 = vsel %vm880_vm2, %v1513_v52, 0 }
 0xbcf   : > { %v1447_v53 = vpack.c.bf16 %v1446_v17, %v1446_v17 }
 0xbd1   : > { %2133 = vmatmul.mubr.msk.bf16.vlgmr.msra.gmra.mrb[24].mxu0 %vm880_vm2, %v1447_v53  ;;  %v1517_v42 = vpop.permute.xlu0 %1516 }
 0xbd2   : > { %2137 = vmatpush3.bf16.xpose.msra.mxu0 %v1524_v21  ;;  %2152 = vmatprep.mubr.msk.bf16.mxu0 %vm2325_vm0, %v2324_v1  ;;  %v1542_v59 = vsel %vm880_vm2, %v1517_v42, 0 }
 0xbd3   : > { %2138 = vmatprep.subr.bf16.mxu0 %v2324_v1 }
 0xbd5   : > { %v1503_v45 = vpop.permute.xlu0 %1502 }
 0xbd9   : > { %v1597_v46 = vpop.permute.xlu0 %1596 }
 0xbda   : > { %2139 = vmatpush3.bf16.xpose.msra.mxu0 %v1527_v54  ;;  %2159 = vmatmul.mubr.msk.bf16.vlgmr.msra.gmra.mrb[20].mxu1 %vm880_vm2, %v1597_v46 }
 0xbdb   : > { %2140 = vmatprep.subr.bf16.mxu0 %v2324_v1  ;;  %2164 = vmatprep.mubr.msk.bf16.mxu1 %vm2325_vm0, %v2324_v1 }
 0xbe2   : > { %2141 = vmatpush3.bf16.xpose.msra.mxu0 %v1530_v55 }
 0xbe3   : > { %2142 = vmatprep.subr.bf16.mxu0 %v2324_v1 }
 0xbea   : > { %2143 = vmatpush3.bf16.xpose.msra.mxu0 %v1533_v56 }
 0xbeb   : > { %2144 = vmatprep.subr.bf16.mxu0 %v2324_v1 }
 0xbf2   : > { %2145 = vmatpush3.bf16.xpose.msra.mxu0 %v1536_v57 }
 0xbf3   : > { %2146 = vmatprep.subr.bf16.mxu0 %v2324_v1 }
 0xbfa   : > { %2147 = vmatpush3.bf16.xpose.msra.mxu0 %v1539_v58 }
 0xbfb   : > { %2148 = vmatprep.subr.bf16.mxu0 %v2324_v1 }
 0xc02   : > { %2149 = vmatpush3.bf16.xpose.msra.mxu0 %v1542_v59 }
 0xc03   : > { %2150 = vmatprep.subr.bf16.mxu0 %v2324_v1 }
 0xc0a   : > { %2151 = vmatpush3.bf16.xpose.msra.mxu0 %v1545_v60 }
 0xc11   : > { %2153 = vmatmul.mubr.msk.bf16.vlgmr.msra.gmra.mrb[28].mxu0 %vm880_vm2, %v1503_v45 }
 0xca4   : > { %v1490_v61 = vpop.f32.mrb[24].mxu0 }
 0xca5   : > { %v2134_v63 = vpop.f32.mrb[25].mxu0 }
 0xca6   : > { %v1493_v0 = vpop.f32.mrb[26].mxu0 }
 0xca7   : > { %v2135_v2 = vpop.f32.mrb[27].mxu0 }
 0xcad   : > { %v1640_v4 = vpop.f32.mrb[20].mxu1 }
 0xcae   : > { %v2160_v5 = vpop.f32.mrb[21].mxu1 }
 0xcaf   : > { %v1643_v9 = vpop.f32.mrb[22].mxu1 }
 0xcb0   : > { %v2161_v10 = vpop.f32.mrb[23].mxu1 }
 0xce4   : > { %v1581_v14 = vpop.f32.mrb[28].mxu0 }
 0xce5   : > { %1587 = vrot.lane.b32.xlu1 %v1581_v14, %s2326_s8  ;;  %v2154_v16 = vpop.f32.mrb[29].mxu0  ;;  %s2333_s8 = smov 16  }
 0xce6   : > { %v1584_v18 = vpop.f32.mrb[30].mxu0 }
 0xce7   : > { %v2155_v20 = vpop.f32.mrb[31].mxu0 }
 0xd57   : > { %v1588_v22 = vpop.permute.xlu1 %1587 }
 0xd58   : > { %v1589_v24 = vsel %vm839_vm3, %v1588_v22, %v1581_v14 }
 0xd59   : > { %1590 = vrot.lane.b32.xlu0 %v1589_v24, %s2327_s23  ;;  %s2334_s23 = smov 8  }
 0xdcb   : > { %v1591_v25 = vpop.permute.xlu0 %1590 }
 0xdcc   : > { %v1592_v26 = vsel %vm836_vm4, %v1591_v25, %v1589_v24 }
 0xdcd   : > { %1593 = vrot.lane.b32.xlu1 %v1592_v26, %s2328_s27 }
 0xe3f   : > { %v1594_v27 = vpop.permute.xlu1 %1593 }
 0xe40   : > { %v1595_v28 = vsel %vm2636_vm5, %v1594_v27, %v1592_v26 }
 0xe41   : > { %v1641_v29 = vadd.f32 %v1640_v4, %v1595_v28 }
 0xe43   : > { %v1646_v30 = vadd.f32 %v2646_v12, %v1641_v29 }
 0xe45   : > { %v1647_v31 = vsel %vm880_vm2, %v1646_v30, -inf }
 0xe46   : > { %1648 = vmax.xlane.f32.xlu0 %v1647_v31 }
 0xe5c   : > { %1659 = vrot.lane.b32.xlu0 %v2683_v49, %s2332_s18 }
 0xe60   : > { %1497 = vrot.lane.b32.xlu0 %v1490_v61, %s2333_s8  ;;  %s1949_s8 = sshll.u32 %s2443_s25, 7  ;;  %s1783_s25 = scalar_lea.sflag [#allocation4], %s560_s20 }
 0xe61   : > { %s2879_s6 = scalar_lea.hbm %s2938_s16, %s1949_s8 }
 0xed3   : > { %v1649_v62 = vpop.xlane.xlu0 %1648 }
 0xed4   : > { %v1650_v3 = vsub.f32 %v1646_v30, %v1649_v62 }
 0xed6   : > { %v1651_v32 = vmul.f32 1.442695, %v1650_v3 }
 0xed7   : > { %v1660_v33 = vpop.permute.xlu0 %1659 }
 0xed8   : > { %2256 = vpow2.f32 %v1651_v32  ;;  %v1665_v34 = vsel %vm1031_vm6, %v1660_v33, 0 }
 0xed9   : > { %2163 = vmatpush3.bf16.msra.mxu1 %v1665_v34 }
 0xeda   : > { %2168 = vmatprep.subr.bf16.mxu1 %v2324_v1 }
 0xedb   : > { %v1498_v36 = vpop.permute.xlu0 %1497 }
 0xee2   : > { %v2257_v8 = vpop.eup %2256 }
 0xee3   : > { %v1653_v12 = vsel %vm880_vm2, %v2257_v8, 0.0 }
 0xee4   : > { %1654 = vadd.xlane.f32.xlu1 %v1653_v12 }
 0xef5   : > { %1286 = vrot.lane.b32.xlu1 %v2779_v6, %s2334_s23  ;;  %v2242_v6 = vld [vmem:[%s2936_s14] sm:$0xff]   ;;  %s562_s23 = scalar_lea.vmem [#allocation3], %s1904_s28  ;;  %s2336_s28 = smov [#allocation3]  }
 0xef6   : > { %s1796_s27 = sshll.u32 %s562_s23, 4  ;;  %s2264_s29 = sshll.u32 %s2336_s28, 4  ;;  %s2881_s27 = int_to_ptr.vmem [resolvable:$true] %s1796_s27  ;;  %s2265_s29 = int_to_ptr.vmem [resolvable:$false] %s2264_s29 }
 0xef7   : > { %s2266_s18 = scalar_lea.vmem %s2265_s29, 256  ;;  %p2267_p0 = scmp.lt.s32.totalorder %s2881_s27, %s2265_s29 }
 0xf71   : > { %v1655_v49 = vpop.xlane.xlu1 %1654 }
 0xf72   : > { %2258 = vrcp.f32 %v1655_v49 }
 0xf75   : > { %v1287_v35 = vpop.permute.xlu1 %1286 }
 0xf76   : > { %1290 = vst.msk [vmem:[#allocation2] sm:$0xff] %vm1289_vm7, %v1287_v35 }
 0xf77   : > { %1501 = vst.msk [vmem:[#allocation2] sm:$0xff] %vm1500_vm8, %v1498_v36 }
 0xf7c   : > { %v2259_v37 = vpop.eup %2258 }
 0xf7d   : > { %v1657_v38 = vmul.f32 %v2259_v37, %v2257_v8 }
 0xf7f   : > { %v1658_v40 = vpack.c.bf16 %v1657_v38, %v1657_v38 }
 0xf81   : > { %2165 = vmatmul.mubr.msk.bf16.vlgmr.msra.gmra.mrb[24].mxu1 %vm880_vm2, %v1658_v40 }
 0xf82   : > { %2172 = vmatprep.mubr.msk.bf16.mxu1 %vm2325_vm0, %v2324_v1  ;;  %2169 = vmatpush3.bf16.msra.mxu1 %v2242_v6 }
 0xf83   : > { %2170 = vmatprep.subr.bf16.mxu1 %v2324_v1  ;;  %v1944_v1 = vld [vmem:[%s2937_s15] ss:$0 sm:$0xff] }
 0xf86   : > { %2171 = vmatpush3.bf16.msra.mxu1 %v2243_v41 }
0x1054   : > { %v1701_v7 = vpop.f32.mrb[24].mxu1 }
0x1055   : > { %1708 = vrot.lane.b32.xlu1 %v1701_v7, %s2335_s30  ;;  %v2166_v43 = vpop.f32.mrb[25].mxu1  ;;  %s2260_s30 = scalar_lea.vmem %s2881_s27, 128 }
0x1056   : > { %v1704_v11 = vpop.f32.mrb[26].mxu1  ;;  %p2261_p11 = scmp.ne.s32.totalorder %s2881_s27, %s2260_s30  ;;  %p2268_p1 = scmp.lt.s32.totalorder %s2266_s18, %s2260_s30 }
0x1057   : > { %v2167_v44 = vpop.f32.mrb[27].mxu1 }
0x1058   : > { %p2262_p12 = pnand %p2261_p11, %p2460_p5  ;;  %p2269_p2 = por %p2268_p1, %p2267_p0 }
0x105a   : > { %p2263_p13 = pneg %p2262_p12 }
0x105c   : > { %p2270_p3 = pnand %p2269_p2, %p2263_p13 }
0x10c7   : > { %v1709_v15 = vpop.permute.xlu1 %1708 }
0x10c8   : > { %1712 = vst.msk [vmem:[#allocation2] sm:$0xff] %vm1711_vm9, %v1709_v15 }
0x10cf   : > { %v1713_v47 = vld [vmem:[#allocation2] sm:$0xff] }
0x10d0   : > { %v1714_v19 = vpack.c.bf16 %v1713_v47, %v1713_v47 }
0x10d2   : > { %2173 = vmatmul.mubr.msk.bf16.vlgmr.msra.gmra.mrb[28].mxu1 %vm625_vm1, %v1714_v19 }
0x11a5   : > { %v1775_v48 = vpop.f32.mrb[28].mxu1 }
0x11a6   : > { %v1776_v23 = vadd.f32 %v1944_v1, %v1775_v48  ;;  %v2174_v39 = vpop.f32.mrb[29].mxu1 }
0x11a7   : > { %v1778_v50 = vpop.f32.mrb[30].mxu1 }
0x11a8   : > { %v2175_v13 = vpop.f32.mrb[31].mxu1  ;;  %1781 = vst.msk [vmem:[%s562_s23] sm:$0xff] %vm625_vm1, %v1776_v23 }
0x11a9   : > { %2273 = shalt.err (!%p2270_p3)
}
0x11aa   : > { %s2274_s20 = scalar_lea.hbm %s2879_s6, 128  ;;  %s2278_s19 = scalar_lea.hbm %s2938_s16, 256 }
0x11ab   : > { %p2275_p4 = scmp.ne.s32.totalorder %s2879_s6, %s2274_s20  ;;  %p2279_p9 = scmp.lt.u32.totalorder %s2879_s6, %s2938_s16 }
0x11ac   : > { %p2280_p10 = scmp.lt.u32.totalorder %s2278_s19, %s2274_s20  ;;  %p2282_p12 = scmp.lt.u32.totalorder %s2274_s20, %s2879_s6 }
0x11ad   : > { %p2276_p7 = pnand %p2275_p4, %p2460_p5 }
0x11ae   : > { %p2281_p11 = por %p2280_p10, %p2279_p9 }
0x11af   : > { %p2277_p8 = pneg %p2276_p7 }
0x11b0   : > { %p2283_p13 = por %p2282_p12, %p2281_p11 }
0x11b2   : > { %p2284_p0 = pnand %p2283_p13, %p2277_p8 }
0x11b4   : > { %2287 = shalt.err (!%p2284_p0)
}
0x11b5   : > { %2176 = dma.vmem_to_hbm [thread:$0]  (%p2460_p5), %s2881_s27, 128, %s2879_s6, %s1783_s25  }
0x11b6 PF: > { %p2182_p1 = scmp.ge.s32.totalorder %s2322_s24, 2  ;;  %s1808_s30 = sand.u32 1, %s2310_s21  }
0x11b7   : > { %s1809_s29 = scalar_lea.sflag [#allocation4], %s1808_s30 }
0x11b8   : > { %p2179_p2 = pnand %p2182_p1, %p2464_p6 }
0x11ba   : > { %2305 = dma.done.wait (!%p2179_p2), %s1809_s29, 128  }
0x11bb   : > { %2307 = vsyncadd (!%p2179_p2), %s1809_s29, 4294967168  ;;  %s2955_s24 = sld [smem:[#allocation7_spill]]  ;;  %s2956_s18 = sld [smem:[#allocation6_spill]] }
0x11bc   : > { %s2957_s23 = sld [smem:[#allocation8_spill]]  ;;  %s2958_s21 = smov %s2314_s22 }
0x11c1   : > { %p26_p3 = scmp.ge.s32.totalorder %s2955_s24, 4   ;;  %s2959_s22 = smov %s2956_s18 }
0x11c3   :  { %28 = sbr.rel (!%p26_p3) target bundleno = 7 (0x7), region = 131 }
0x11ca   :  { %1814 = vsyncpa [#allocation4], 1 }
0x11cb   :  { %1816 = vsyncpa [#allocation4 + $0x1], 1 }

</bundles_post_ra>
